<compile_context>
chip_gen: v5e
topology: v5e:2x2
jax: 0.10.0
libtpu: 0.0.40
codegen_flags: <defaults>
</compile_context>

<pallas_src>
import jax
import jax.numpy as jnp
import numpy as np
from jax import lax
from jax.experimental import pallas as pl
from jax.experimental.pallas import tpu as pltpu


# ----------------------------- Pallas kernel ------------------------------- #

def _consistency_kernel(yc_ref, xc_ref, yr_ref, xr_ref, binsq_ref,
                        q1_ref, k2_ref, q2_ref, k1_ref,
                        mask1_ref, mask2_ref, loss1_ref, loss2_ref, cnt_ref):
    """Fused PixPro consistency loss for a block of `bn` batch elements.

    Inputs per block:
      yc/xc : (bn, HW, 1)  patch-center coords of view 1 (column vectors)
      yr/xr : (bn, 1, HW)  patch-center coords of view 2 (row vectors)
      binsq : (bn, 1, 1)   (thresh * max_bin_diag)^2
      q1,k2,q2,k1 : (bn, C, HW)  feature maps in native (C, HW) layout
    Outputs per block:
      mask1, mask2 : (bn, HW, HW) float positive-pair masks (mask2 == mask1.T)
      loss1, loss2 : (bn, 1, 1)   masked mean similarity per batch element
      cnt          : (bn, 1, 1)   number of positive pairs per batch element
    """
    bn = mask1_ref.shape[0]
    # contract the channel dim (dim 0) of both operands: (C,HW)^T @ (C,HW)
    dn = (((0,), (0,)), ((), ()))

    # Static unroll over the (small) batch block.
    for b in range(bn):
        # squared pairwise distances between patch centers of the two views
        dy = yc_ref[b] - yr_ref[b]                        # (HW,1)-(1,HW) -> (HW,HW)
        dx = xc_ref[b] - xr_ref[b]
        d2 = dy * dy + dx * dx

        # positive-pair mask: d^2 < (thresh*bin)^2  (== dist/bin < thresh,
        # without the sqrt, the full-matrix divide, or div-by-zero).
        mask = (d2 < binsq_ref[b]).astype(jnp.float32)    # (HW, HW)
        mask1_ref[b] = mask
        mask2_ref[b] = mask.T                             # reverse pass == transpose

        # similarities on the MXU; LHS arrives transposed ((C,HW)) natively.
        sim1 = lax.dot_general(q1_ref[b], k2_ref[b], dn,
                               preferred_element_type=jnp.float32)    # (HW, HW)
        # sim2^T == k1^T.q2 contracted the same way, so it reduces directly
        # against `mask` (sum(sim2 * mask.T) == sum(sim2.T * mask)).
        sim2_t = lax.dot_general(k1_ref[b], q2_ref[b], dn,
                                 preferred_element_type=jnp.float32)  # (HW, HW)

        msum = jnp.sum(mask)
        den = msum + 1e-6
        loss1_ref[b] = jnp.reshape(jnp.sum(sim1 * mask) / den, (1, 1))
        loss2_ref[b] = jnp.reshape(jnp.sum(sim2_t * mask) / den, (1, 1))
        cnt_ref[b] = jnp.reshape(msum, (1, 1))


def _largest_divisor_leq(n, cap):
    for d in range(min(n, cap), 0, -1):
        if n % d == 0:
            return d
    return 1


def _fused_consistency(y_c1, x_c1, y_r2, x_r2, binsq, q1, k2, q2, k1,
                       batch_block=None):
    """Single pallas_call computing both PixPro passes."""
    N, HW, _ = y_c1.shape
    C = q1.shape[1]
    bn = batch_block if batch_block is not None else _largest_divisor_leq(N, 8)
    grid = (N // bn,)

    coord_col_spec = pl.BlockSpec((bn, HW, 1), lambda i: (i, 0, 0))
    coord_row_spec = pl.BlockSpec((bn, 1, HW), lambda i: (i, 0, 0))
    scalar_spec = pl.BlockSpec((bn, 1, 1), lambda i: (i, 0, 0))
    feat_spec = pl.BlockSpec((bn, C, HW), lambda i: (i, 0, 0))
    mask_spec = pl.BlockSpec((bn, HW, HW), lambda i: (i, 0, 0))

    mask1, mask2, loss1, loss2, cnt = pl.pallas_call(
        _consistency_kernel,
        out_shape=(
            jax.ShapeDtypeStruct((N, HW, HW), jnp.float32),   # mask1
            jax.ShapeDtypeStruct((N, HW, HW), jnp.float32),   # mask2 (= mask1.T)
            jax.ShapeDtypeStruct((N, 1, 1), jnp.float32),     # loss1 per batch
            jax.ShapeDtypeStruct((N, 1, 1), jnp.float32),     # loss2 per batch
            jax.ShapeDtypeStruct((N, 1, 1), jnp.float32),     # positive-pair count
        ),
        grid_spec=pltpu.PrefetchScalarGridSpec(
            num_scalar_prefetch=0,
            grid=grid,
            in_specs=[
                coord_col_spec,   # y centers view 1
                coord_col_spec,   # x centers view 1
                coord_row_spec,   # y centers view 2
                coord_row_spec,   # x centers view 2
                scalar_spec,      # (thresh * bin_diag)^2
                feat_spec,        # q view 1 (C, HW)
                feat_spec,        # k view 2 (C, HW)
                feat_spec,        # q view 2 (C, HW)
                feat_spec,        # k view 1 (C, HW)
            ],
            out_specs=(
                mask_spec, mask_spec, scalar_spec, scalar_spec, scalar_spec,
            ),
        ),
        compiler_params=pltpu.CompilerParams(
            dimension_semantics=("parallel",)),   # batch axis is independent
    )(y_c1, x_c1, y_r2, x_r2, binsq, q1, k2, q2, k1)

    return mask1, mask2, loss1[:, 0, 0], loss2[:, 0, 0], cnt[:, 0, 0]


# ----------------------------- plain-JAX glue ------------------------------ #

def _linspace(start, stop, num):
    steps = jnp.arange(num, dtype=jnp.float32) / (num - 1)
    return start[:, None] + steps[None, :] * (stop - start)[:, None]


def _get_proj_coords(coord, H, W):
    # coord: (N, 4) = [y0, x0, y1, x1]
    offset_x = (coord[:, 3] - coord[:, 1]) / (2 * W)
    centers_x = _linspace(coord[:, 1] + offset_x, coord[:, 3] - offset_x, W)  # (N, W)
    offset_y = (coord[:, 2] - coord[:, 0]) / (2 * H)
    centers_y = _linspace(coord[:, 0] + offset_y, coord[:, 2] - offset_y, H)  # (N, H)
    N = coord.shape[0]
    grid_x = jnp.broadcast_to(centers_x[:, None, :], (N, H, W))               # (N, H, W)
    grid_y = jnp.broadcast_to(centers_y[:, :, None], (N, H, W))               # (N, H, W)
    bin_diag = jnp.sqrt((offset_x * 2.0) ** 2 + (offset_y * 2.0) ** 2)        # (N,)
    return grid_y, grid_x, bin_diag


class ConsistencyLoss:
    """JAX/Pallas port of the PixPro ConsistencyLoss module (forward only)."""

    def __init__(self, distance_threshold: float):
        self.thresh = float(distance_threshold)

    def __call__(self, feat_q_view1, feat_q_view2, feat_k_view1, feat_k_view2,
                 coords_view1, coords_view2):
        N, C, H, W = feat_q_view1.shape
        HW = H * W

        gy1, gx1, bd1 = _get_proj_coords(coords_view1, H, W)
        gy2, gx2, bd2 = _get_proj_coords(coords_view2, H, W)
        bin_max = jnp.maximum(bd1, bd2)
        binsq = ((self.thresh * bin_max) ** 2).reshape(N, 1, 1).astype(jnp.float32)

        # view-1 centers as columns, view-2 centers as rows (pure broadcast
        # makes the (HW, HW) distance matrix inside the kernel).
        y_c1 = gy1.reshape(N, HW, 1)
        x_c1 = gx1.reshape(N, HW, 1)
        y_r2 = gy2.reshape(N, 1, HW)
        x_r2 = gx2.reshape(N, 1, HW)

        # features stay in their native (N, C, HW) layout: no XLA transpose.
        q1 = feat_q_view1.reshape(N, C, HW)
        k2 = feat_k_view2.reshape(N, C, HW)
        q2 = feat_q_view2.reshape(N, C, HW)
        k1 = feat_k_view1.reshape(N, C, HW)

        mask1, mask2, loss1, loss2, cnt = _fused_consistency(
            y_c1, x_c1, y_r2, x_r2, binsq, q1, k2, q2, k1)

        # Faithful to torch: return None when there are no positive pairs.
        # Checked via the tiny per-batch count (no full-mask host transfer).
        # TODO(synk): this host-side early-return prevents wrapping __call__ in jax.jit.
        if float(jnp.sum(cnt)) == 0.0:
            return None

        loss = -jnp.mean(loss1) - jnp.mean(loss2)
        log_dict = {"matches1": mask1, "matches2": mask2}
        return loss, log_dict


# ------------------------- pure-JAX reference check ------------------------ #

def _reference_loss(fq1, fq2, fk1, fk2, c1, c2, thresh):
    N, C, H, W = fq1.shape
    HW = H * W
    gy1, gx1, bd1 = _get_proj_coords(c1, H, W)
    gy2, gx2, bd2 = _get_proj_coords(c2, H, W)
    p1 = jnp.stack([gy1.reshape(N, HW), gx1.reshape(N, HW)], axis=-1)
    p2 = jnp.stack([gy2.reshape(N, HW), gx2.reshape(N, HW)], axis=-1)
    bin_max = jnp.maximum(bd1, bd2)[:, None, None]

    def cdist(a, b):
        d = a[:, :, None, :] - b[:, None, :, :]
        return jnp.sqrt(jnp.sum(d * d, axis=-1))

    m1 = (cdist(p1, p2) / bin_max < thresh).astype(jnp.float32)
    m2 = (cdist(p2, p1) / bin_max < thresh).astype(jnp.float32)

    q1 = jnp.transpose(fq1.reshape(N, C, HW), (0, 2, 1))
    k2 = fk2.reshape(N, C, HW)
    q2 = jnp.transpose(fq2.reshape(N, C, HW), (0, 2, 1))
    k1 = fk1.reshape(N, C, HW)
    s1 = jnp.einsum("npc,nck->npk", q1, k2)
    s2 = jnp.einsum("npc,nck->npk", q2, k1)
    l1 = (s1 * m1).sum((-1, -2)) / (m1.sum((-1, -2)) + 1e-6)
    l2 = (s2 * m2).sum((-1, -2)) / (m2.sum((-1, -2)) + 1e-6)
    return -l1.mean() - l2.mean()


# ----------------------------------- main ----------------------------------- #

if __name__ == "__main__":
    N, C, H, W = 2, 32, 8, 8

    key = jax.random.PRNGKey(0)
    ka, kb, kc, kd = jax.random.split(key, 4)
    feat_q_view1 = jax.random.normal(ka, (N, C, H, W), dtype=jnp.float32)
    feat_q_view2 = jax.random.normal(kb, (N, C, H, W), dtype=jnp.float32)
    feat_k_view1 = jax.random.normal(kc, (N, C, H, W), dtype=jnp.float32)
    feat_k_view2 = jax.random.normal(kd, (N, C, H, W), dtype=jnp.float32)

    # deterministic overlapping crop boxes: [y0, x0, y1, x1]
    coords_view1 = jnp.array([[0.00, 0.00, 0.70, 0.70],
                              [0.10, 0.10, 0.90, 0.90]], dtype=jnp.float32)
    coords_view2 = jnp.array([[0.20, 0.20, 1.00, 1.00],
                              [0.00, 0.25, 0.80, 1.00]], dtype=jnp.float32)

    loss_fn = ConsistencyLoss(distance_threshold=0.7)
    out = loss_fn(feat_q_view1, feat_q_view2, feat_k_view1, feat_k_view2,
                  coords_view1, coords_view2)
    assert out is not None, "expected positive pairs for these synthetic crops"
    loss, log_dict = out
    jax.block_until_ready(loss)
    jax.block_until_ready(log_dict["matches1"])
    jax.block_until_ready(log_dict["matches2"])

    ref = _reference_loss(feat_q_view1, feat_q_view2, feat_k_view1, feat_k_view2,
                          coords_view1, coords_view2, 0.7)
    np.testing.assert_allclose(np.asarray(loss), np.asarray(ref),
                               rtol=1e-3, atol=1e-3)

    print("KERNEL_OK")
</pallas_src>

<mosaic_0001>
module attributes {stable_mosaic.version = 11 : i64} {
  func.func @_consistency_kernel(%arg0: i32, %arg1: memref<2x64x1xf32, #tpu.memory_space<vmem>>, %arg2: memref<2x64x1xf32, #tpu.memory_space<vmem>>, %arg3: memref<2x1x64xf32, #tpu.memory_space<vmem>>, %arg4: memref<2x1x64xf32, #tpu.memory_space<vmem>>, %arg5: memref<2x1x1xf32, #tpu.memory_space<vmem>>, %arg6: memref<2x32x64xf32, #tpu.memory_space<vmem>>, %arg7: memref<2x32x64xf32, #tpu.memory_space<vmem>>, %arg8: memref<2x32x64xf32, #tpu.memory_space<vmem>>, %arg9: memref<2x32x64xf32, #tpu.memory_space<vmem>>, %arg10: memref<2x64x64xf32, #tpu.memory_space<vmem>>, %arg11: memref<2x64x64xf32, #tpu.memory_space<vmem>>, %arg12: memref<2x1x1xf32, #tpu.memory_space<vmem>>, %arg13: memref<2x1x1xf32, #tpu.memory_space<vmem>>, %arg14: memref<2x1x1xf32, #tpu.memory_space<vmem>>) attributes {dimension_semantics = [#tpu.dimension_semantics<parallel>], iteration_bounds = array<i64: 1>, scalar_prefetch = 0 : i64, scratch_operands = 0 : i64, tpu.core_type = #tpu.core_type<tc>, window_params = [{transform_indices = @transform_0, window_bounds = array<i64: 2, 64, 1>}, {transform_indices = @transform_1, window_bounds = array<i64: 2, 64, 1>}, {transform_indices = @transform_2, window_bounds = array<i64: 2, 1, 64>}, {transform_indices = @transform_3, window_bounds = array<i64: 2, 1, 64>}, {transform_indices = @transform_4, window_bounds = array<i64: 2, 1, 1>}, {transform_indices = @transform_5, window_bounds = array<i64: 2, 32, 64>}, {transform_indices = @transform_6, window_bounds = array<i64: 2, 32, 64>}, {transform_indices = @transform_7, window_bounds = array<i64: 2, 32, 64>}, {transform_indices = @transform_8, window_bounds = array<i64: 2, 32, 64>}, {transform_indices = @transform_9, window_bounds = array<i64: 2, 64, 64>}, {transform_indices = @transform_10, window_bounds = array<i64: 2, 64, 64>}, {transform_indices = @transform_11, window_bounds = array<i64: 2, 1, 1>}, {transform_indices = @transform_12, window_bounds = array<i64: 2, 1, 1>}, {transform_indices = @transform_13, window_bounds = array<i64: 2, 1, 1>}]} {
    %c0 = arith.constant 0 : index
    %c0_0 = arith.constant 0 : index
    %c0_1 = arith.constant 0 : index
    %0 = vector.load %arg1[%c0, %c0_0, %c0_1] : memref<2x64x1xf32, #tpu.memory_space<vmem>>, vector<1x64x1xf32>
    %1 = vector.shape_cast %0 : vector<1x64x1xf32> to vector<64x1xf32>
    %c0_2 = arith.constant 0 : index
    %c0_3 = arith.constant 0 : index
    %c0_4 = arith.constant 0 : index
    %2 = vector.load %arg3[%c0_2, %c0_3, %c0_4] : memref<2x1x64xf32, #tpu.memory_space<vmem>>, vector<1x1x64xf32>
    %3 = vector.shape_cast %2 : vector<1x1x64xf32> to vector<1x64xf32>
    %4 = vector.broadcast %1 : vector<64x1xf32> to vector<64x64xf32>
    %5 = vector.broadcast %3 : vector<1x64xf32> to vector<64x64xf32>
    %6 = arith.subf %4, %5 : vector<64x64xf32>
    %c0_5 = arith.constant 0 : index
    %c0_6 = arith.constant 0 : index
    %c0_7 = arith.constant 0 : index
    %7 = vector.load %arg2[%c0_5, %c0_6, %c0_7] : memref<2x64x1xf32, #tpu.memory_space<vmem>>, vector<1x64x1xf32>
    %8 = vector.shape_cast %7 : vector<1x64x1xf32> to vector<64x1xf32>
    %c0_8 = arith.constant 0 : index
    %c0_9 = arith.constant 0 : index
    %c0_10 = arith.constant 0 : index
    %9 = vector.load %arg4[%c0_8, %c0_9, %c0_10] : memref<2x1x64xf32, #tpu.memory_space<vmem>>, vector<1x1x64xf32>
    %10 = vector.shape_cast %9 : vector<1x1x64xf32> to vector<1x64xf32>
    %11 = vector.broadcast %8 : vector<64x1xf32> to vector<64x64xf32>
    %12 = vector.broadcast %10 : vector<1x64xf32> to vector<64x64xf32>
    %13 = arith.subf %11, %12 : vector<64x64xf32>
    %14 = arith.mulf %6, %6 : vector<64x64xf32>
    %15 = arith.mulf %13, %13 : vector<64x64xf32>
    %16 = arith.addf %14, %15 : vector<64x64xf32>
    %c0_11 = arith.constant 0 : index
    %c0_12 = arith.constant 0 : index
    %c0_13 = arith.constant 0 : index
    %17 = vector.load %arg5[%c0_11, %c0_12, %c0_13] : memref<2x1x1xf32, #tpu.memory_space<vmem>>, vector<1x1x1xf32>
    %18 = vector.shape_cast %17 : vector<1x1x1xf32> to vector<1x1xf32>
    %19 = vector.broadcast %18 : vector<1x1xf32> to vector<64x64xf32>
    %20 = arith.cmpf olt, %16, %19 : vector<64x64xf32>
    %21 = arith.extui %20 : vector<64x64xi1> to vector<64x64xi32>
    %22 = arith.sitofp %21 : vector<64x64xi32> to vector<64x64xf32>
    %c0_14 = arith.constant 0 : index
    %c0_15 = arith.constant 0 : index
    %c0_16 = arith.constant 0 : index
    %23 = vector.load %arg10[%c0_14, %c0_15, %c0_16] : memref<2x64x64xf32, #tpu.memory_space<vmem>>, vector<1x64x64xf32>
    %24 = vector.shape_cast %23 : vector<1x64x64xf32> to vector<64x64xf32>
    %25 = vector.shape_cast %22 : vector<64x64xf32> to vector<1x64x64xf32>
    tpu.vector_store %arg10[%c0_14, %c0_15, %c0_16], %25 {strides = array<i32>} : memref<2x64x64xf32, #tpu.memory_space<vmem>>, vector<1x64x64xf32>,
    %26 = tpu.transpose %22, [1, 0] : vector<64x64xf32> -> vector<64x64xf32>
    %c0_17 = arith.constant 0 : index
    %c0_18 = arith.constant 0 : index
    %c0_19 = arith.constant 0 : index
    %27 = vector.load %arg11[%c0_17, %c0_18, %c0_19] : memref<2x64x64xf32, #tpu.memory_space<vmem>>, vector<1x64x64xf32>
    %28 = vector.shape_cast %27 : vector<1x64x64xf32> to vector<64x64xf32>
    %29 = vector.shape_cast %26 : vector<64x64xf32> to vector<1x64x64xf32>
    tpu.vector_store %arg11[%c0_17, %c0_18, %c0_19], %29 {strides = array<i32>} : memref<2x64x64xf32, #tpu.memory_space<vmem>>, vector<1x64x64xf32>,
    %c0_20 = arith.constant 0 : index
    %c0_21 = arith.constant 0 : index
    %c0_22 = arith.constant 0 : index
    %30 = vector.load %arg6[%c0_20, %c0_21, %c0_22] : memref<2x32x64xf32, #tpu.memory_space<vmem>>, vector<1x32x64xf32>
    %31 = vector.shape_cast %30 : vector<1x32x64xf32> to vector<32x64xf32>
    %c0_23 = arith.constant 0 : index
    %c0_24 = arith.constant 0 : index
    %c0_25 = arith.constant 0 : index
    %32 = vector.load %arg7[%c0_23, %c0_24, %c0_25] : memref<2x32x64xf32, #tpu.memory_space<vmem>>, vector<1x32x64xf32>
    %33 = vector.shape_cast %32 : vector<1x32x64xf32> to vector<32x64xf32>
    %cst = arith.constant dense<0.000000e+00> : vector<64x64xf32>
    %34 = tpu.matmul %31, %33, %cst {dimension_numbers = #tpu.dot_dimension_numbers<[0], [0], [1], [1], [0, 1, 1, 1], [], []>} : vector<32x64xf32>, vector<32x64xf32>, vector<64x64xf32> -> vector<64x64xf32>
    %c0_26 = arith.constant 0 : index
    %c0_27 = arith.constant 0 : index
    %c0_28 = arith.constant 0 : index
    %35 = vector.load %arg9[%c0_26, %c0_27, %c0_28] : memref<2x32x64xf32, #tpu.memory_space<vmem>>, vector<1x32x64xf32>
    %36 = vector.shape_cast %35 : vector<1x32x64xf32> to vector<32x64xf32>
    %c0_29 = arith.constant 0 : index
    %c0_30 = arith.constant 0 : index
    %c0_31 = arith.constant 0 : index
    %37 = vector.load %arg8[%c0_29, %c0_30, %c0_31] : memref<2x32x64xf32, #tpu.memory_space<vmem>>, vector<1x32x64xf32>
    %38 = vector.shape_cast %37 : vector<1x32x64xf32> to vector<32x64xf32>
    %cst_32 = arith.constant dense<0.000000e+00> : vector<64x64xf32>
    %39 = tpu.matmul %36, %38, %cst_32 {dimension_numbers = #tpu.dot_dimension_numbers<[0], [0], [1], [1], [0, 1, 1, 1], [], []>} : vector<32x64xf32>, vector<32x64xf32>, vector<64x64xf32> -> vector<64x64xf32>
    %40 = vector.shape_cast %22 : vector<64x64xf32> to vector<1x64x64xf32>
    %cst_33 = arith.constant dense<0.000000e+00> : vector<1xf32>
    %41 = vector.multi_reduction <add>, %40, %cst_33 [1, 2] : vector<1x64x64xf32> to vector<1xf32>
    %42 = vector.shape_cast %41 : vector<1xf32> to vector<1x1x1xf32>
    %43 = vector.extract %42[0, 0, 0] : f32 from vector<1x1x1xf32>
    %cst_34 = arith.constant 9.99999997E-7 : f32
    %44 = arith.addf %43, %cst_34 : f32
    %45 = arith.mulf %34, %22 : vector<64x64xf32>
    %46 = vector.shape_cast %45 : vector<64x64xf32> to vector<1x64x64xf32>
    %cst_35 = arith.constant dense<0.000000e+00> : vector<1xf32>
    %47 = vector.multi_reduction <add>, %46, %cst_35 [1, 2] : vector<1x64x64xf32> to vector<1xf32>
    %48 = vector.shape_cast %47 : vector<1xf32> to vector<1x1x1xf32>
    %49 = vector.extract %48[0, 0, 0] : f32 from vector<1x1x1xf32>
    %50 = arith.divf %49, %44 : f32
    %51 = vector.broadcast %50 : f32 to vector<1x1xf32>
    %c0_36 = arith.constant 0 : index
    %c0_37 = arith.constant 0 : index
    %c0_38 = arith.constant 0 : index
    %52 = vector.load %arg12[%c0_36, %c0_37, %c0_38] : memref<2x1x1xf32, #tpu.memory_space<vmem>>, vector<1x1x1xf32>
    %53 = vector.shape_cast %52 : vector<1x1x1xf32> to vector<1x1xf32>
    %54 = vector.shape_cast %51 : vector<1x1xf32> to vector<1x1x1xf32>
    tpu.vector_store %arg12[%c0_36, %c0_37, %c0_38], %54 {strides = array<i32>} : memref<2x1x1xf32, #tpu.memory_space<vmem>>, vector<1x1x1xf32>,
    %55 = arith.mulf %39, %22 : vector<64x64xf32>
    %56 = vector.shape_cast %55 : vector<64x64xf32> to vector<1x64x64xf32>
    %cst_39 = arith.constant dense<0.000000e+00> : vector<1xf32>
    %57 = vector.multi_reduction <add>, %56, %cst_39 [1, 2] : vector<1x64x64xf32> to vector<1xf32>
    %58 = vector.shape_cast %57 : vector<1xf32> to vector<1x1x1xf32>
    %59 = vector.extract %58[0, 0, 0] : f32 from vector<1x1x1xf32>
    %60 = arith.divf %59, %44 : f32
    %61 = vector.broadcast %60 : f32 to vector<1x1xf32>
    %c0_40 = arith.constant 0 : index
    %c0_41 = arith.constant 0 : index
    %c0_42 = arith.constant 0 : index
    %62 = vector.load %arg13[%c0_40, %c0_41, %c0_42] : memref<2x1x1xf32, #tpu.memory_space<vmem>>, vector<1x1x1xf32>
    %63 = vector.shape_cast %62 : vector<1x1x1xf32> to vector<1x1xf32>
    %64 = vector.shape_cast %61 : vector<1x1xf32> to vector<1x1x1xf32>
    tpu.vector_store %arg13[%c0_40, %c0_41, %c0_42], %64 {strides = array<i32>} : memref<2x1x1xf32, #tpu.memory_space<vmem>>, vector<1x1x1xf32>,
    %65 = vector.broadcast %43 : f32 to vector<1x1xf32>
    %c0_43 = arith.constant 0 : index
    %c0_44 = arith.constant 0 : index
    %c0_45 = arith.constant 0 : index
    %66 = vector.load %arg14[%c0_43, %c0_44, %c0_45] : memref<2x1x1xf32, #tpu.memory_space<vmem>>, vector<1x1x1xf32>
    %67 = vector.shape_cast %66 : vector<1x1x1xf32> to vector<1x1xf32>
    %68 = vector.shape_cast %65 : vector<1x1xf32> to vector<1x1x1xf32>
    tpu.vector_store %arg14[%c0_43, %c0_44, %c0_45], %68 {strides = array<i32>} : memref<2x1x1xf32, #tpu.memory_space<vmem>>, vector<1x1x1xf32>,
    %c1 = arith.constant 1 : index
    %c0_46 = arith.constant 0 : index
    %c0_47 = arith.constant 0 : index
    %69 = vector.load %arg1[%c1, %c0_46, %c0_47] : memref<2x64x1xf32, #tpu.memory_space<vmem>>, vector<1x64x1xf32>
    %70 = vector.shape_cast %69 : vector<1x64x1xf32> to vector<64x1xf32>
    %c1_48 = arith.constant 1 : index
    %c0_49 = arith.constant 0 : index
    %c0_50 = arith.constant 0 : index
    %71 = vector.load %arg3[%c1_48, %c0_49, %c0_50] : memref<2x1x64xf32, #tpu.memory_space<vmem>>, vector<1x1x64xf32>
    %72 = vector.shape_cast %71 : vector<1x1x64xf32> to vector<1x64xf32>
    %73 = vector.broadcast %70 : vector<64x1xf32> to vector<64x64xf32>
    %74 = vector.broadcast %72 : vector<1x64xf32> to vector<64x64xf32>
    %75 = arith.subf %73, %74 : vector<64x64xf32>
    %c1_51 = arith.constant 1 : index
    %c0_52 = arith.constant 0 : index
    %c0_53 = arith.constant 0 : index
    %76 = vector.load %arg2[%c1_51, %c0_52, %c0_53] : memref<2x64x1xf32, #tpu.memory_space<vmem>>, vector<1x64x1xf32>
    %77 = vector.shape_cast %76 : vector<1x64x1xf32> to vector<64x1xf32>
    %c1_54 = arith.constant 1 : index
    %c0_55 = arith.constant 0 : index
    %c0_56 = arith.constant 0 : index
    %78 = vector.load %arg4[%c1_54, %c0_55, %c0_56] : memref<2x1x64xf32, #tpu.memory_space<vmem>>, vector<1x1x64xf32>
    %79 = vector.shape_cast %78 : vector<1x1x64xf32> to vector<1x64xf32>
    %80 = vector.broadcast %77 : vector<64x1xf32> to vector<64x64xf32>
    %81 = vector.broadcast %79 : vector<1x64xf32> to vector<64x64xf32>
    %82 = arith.subf %80, %81 : vector<64x64xf32>
    %83 = arith.mulf %75, %75 : vector<64x64xf32>
    %84 = arith.mulf %82, %82 : vector<64x64xf32>
    %85 = arith.addf %83, %84 : vector<64x64xf32>
    %c1_57 = arith.constant 1 : index
    %c0_58 = arith.constant 0 : index
    %c0_59 = arith.constant 0 : index
    %86 = vector.load %arg5[%c1_57, %c0_58, %c0_59] : memref<2x1x1xf32, #tpu.memory_space<vmem>>, vector<1x1x1xf32>
    %87 = vector.shape_cast %86 : vector<1x1x1xf32> to vector<1x1xf32>
    %88 = vector.broadcast %87 : vector<1x1xf32> to vector<64x64xf32>
    %89 = arith.cmpf olt, %85, %88 : vector<64x64xf32>
    %90 = arith.extui %89 : vector<64x64xi1> to vector<64x64xi32>
    %91 = arith.sitofp %90 : vector<64x64xi32> to vector<64x64xf32>
    %c1_60 = arith.constant 1 : index
    %c0_61 = arith.constant 0 : index
    %c0_62 = arith.constant 0 : index
    %92 = vector.load %arg10[%c1_60, %c0_61, %c0_62] : memref<2x64x64xf32, #tpu.memory_space<vmem>>, vector<1x64x64xf32>
    %93 = vector.shape_cast %92 : vector<1x64x64xf32> to vector<64x64xf32>
    %94 = vector.shape_cast %91 : vector<64x64xf32> to vector<1x64x64xf32>
    tpu.vector_store %arg10[%c1_60, %c0_61, %c0_62], %94 {strides = array<i32>} : memref<2x64x64xf32, #tpu.memory_space<vmem>>, vector<1x64x64xf32>,
    %95 = tpu.transpose %91, [1, 0] : vector<64x64xf32> -> vector<64x64xf32>
    %c1_63 = arith.constant 1 : index
    %c0_64 = arith.constant 0 : index
    %c0_65 = arith.constant 0 : index
    %96 = vector.load %arg11[%c1_63, %c0_64, %c0_65] : memref<2x64x64xf32, #tpu.memory_space<vmem>>, vector<1x64x64xf32>
    %97 = vector.shape_cast %96 : vector<1x64x64xf32> to vector<64x64xf32>
    %98 = vector.shape_cast %95 : vector<64x64xf32> to vector<1x64x64xf32>
    tpu.vector_store %arg11[%c1_63, %c0_64, %c0_65], %98 {strides = array<i32>} : memref<2x64x64xf32, #tpu.memory_space<vmem>>, vector<1x64x64xf32>,
    %c1_66 = arith.constant 1 : index
    %c0_67 = arith.constant 0 : index
    %c0_68 = arith.constant 0 : index
    %99 = vector.load %arg6[%c1_66, %c0_67, %c0_68] : memref<2x32x64xf32, #tpu.memory_space<vmem>>, vector<1x32x64xf32>
    %100 = vector.shape_cast %99 : vector<1x32x64xf32> to vector<32x64xf32>
    %c1_69 = arith.constant 1 : index
    %c0_70 = arith.constant 0 : index
    %c0_71 = arith.constant 0 : index
    %101 = vector.load %arg7[%c1_69, %c0_70, %c0_71] : memref<2x32x64xf32, #tpu.memory_space<vmem>>, vector<1x32x64xf32>
    %102 = vector.shape_cast %101 : vector<1x32x64xf32> to vector<32x64xf32>
    %cst_72 = arith.constant dense<0.000000e+00> : vector<64x64xf32>
    %103 = tpu.matmul %100, %102, %cst_72 {dimension_numbers = #tpu.dot_dimension_numbers<[0], [0], [1], [1], [0, 1, 1, 1], [], []>} : vector<32x64xf32>, vector<32x64xf32>, vector<64x64xf32> -> vector<64x64xf32>
    %c1_73 = arith.constant 1 : index
    %c0_74 = arith.constant 0 : index
    %c0_75 = arith.constant 0 : index
    %104 = vector.load %arg9[%c1_73, %c0_74, %c0_75] : memref<2x32x64xf32, #tpu.memory_space<vmem>>, vector<1x32x64xf32>
    %105 = vector.shape_cast %104 : vector<1x32x64xf32> to vector<32x64xf32>
    %c1_76 = arith.constant 1 : index
    %c0_77 = arith.constant 0 : index
    %c0_78 = arith.constant 0 : index
    %106 = vector.load %arg8[%c1_76, %c0_77, %c0_78] : memref<2x32x64xf32, #tpu.memory_space<vmem>>, vector<1x32x64xf32>
    %107 = vector.shape_cast %106 : vector<1x32x64xf32> to vector<32x64xf32>
    %cst_79 = arith.constant dense<0.000000e+00> : vector<64x64xf32>
    %108 = tpu.matmul %105, %107, %cst_79 {dimension_numbers = #tpu.dot_dimension_numbers<[0], [0], [1], [1], [0, 1, 1, 1], [], []>} : vector<32x64xf32>, vector<32x64xf32>, vector<64x64xf32> -> vector<64x64xf32>
    %109 = vector.shape_cast %91 : vector<64x64xf32> to vector<1x64x64xf32>
    %cst_80 = arith.constant dense<0.000000e+00> : vector<1xf32>
    %110 = vector.multi_reduction <add>, %109, %cst_80 [1, 2] : vector<1x64x64xf32> to vector<1xf32>
    %111 = vector.shape_cast %110 : vector<1xf32> to vector<1x1x1xf32>
    %112 = vector.extract %111[0, 0, 0] : f32 from vector<1x1x1xf32>
    %cst_81 = arith.constant 9.99999997E-7 : f32
    %113 = arith.addf %112, %cst_81 : f32
    %114 = arith.mulf %103, %91 : vector<64x64xf32>
    %115 = vector.shape_cast %114 : vector<64x64xf32> to vector<1x64x64xf32>
    %cst_82 = arith.constant dense<0.000000e+00> : vector<1xf32>
    %116 = vector.multi_reduction <add>, %115, %cst_82 [1, 2] : vector<1x64x64xf32> to vector<1xf32>
    %117 = vector.shape_cast %116 : vector<1xf32> to vector<1x1x1xf32>
    %118 = vector.extract %117[0, 0, 0] : f32 from vector<1x1x1xf32>
    %119 = arith.divf %118, %113 : f32
    %120 = vector.broadcast %119 : f32 to vector<1x1xf32>
    %c1_83 = arith.constant 1 : index
    %c0_84 = arith.constant 0 : index
    %c0_85 = arith.constant 0 : index
    %121 = vector.load %arg12[%c1_83, %c0_84, %c0_85] : memref<2x1x1xf32, #tpu.memory_space<vmem>>, vector<1x1x1xf32>
    %122 = vector.shape_cast %121 : vector<1x1x1xf32> to vector<1x1xf32>
    %123 = vector.shape_cast %120 : vector<1x1xf32> to vector<1x1x1xf32>
    tpu.vector_store %arg12[%c1_83, %c0_84, %c0_85], %123 {strides = array<i32>} : memref<2x1x1xf32, #tpu.memory_space<vmem>>, vector<1x1x1xf32>,
    %124 = arith.mulf %108, %91 : vector<64x64xf32>
    %125 = vector.shape_cast %124 : vector<64x64xf32> to vector<1x64x64xf32>
    %cst_86 = arith.constant dense<0.000000e+00> : vector<1xf32>
    %126 = vector.multi_reduction <add>, %125, %cst_86 [1, 2] : vector<1x64x64xf32> to vector<1xf32>
    %127 = vector.shape_cast %126 : vector<1xf32> to vector<1x1x1xf32>
    %128 = vector.extract %127[0, 0, 0] : f32 from vector<1x1x1xf32>
    %129 = arith.divf %128, %113 : f32
    %130 = vector.broadcast %129 : f32 to vector<1x1xf32>
    %c1_87 = arith.constant 1 : index
    %c0_88 = arith.constant 0 : index
    %c0_89 = arith.constant 0 : index
    %131 = vector.load %arg13[%c1_87, %c0_88, %c0_89] : memref<2x1x1xf32, #tpu.memory_space<vmem>>, vector<1x1x1xf32>
    %132 = vector.shape_cast %131 : vector<1x1x1xf32> to vector<1x1xf32>
    %133 = vector.shape_cast %130 : vector<1x1xf32> to vector<1x1x1xf32>
    tpu.vector_store %arg13[%c1_87, %c0_88, %c0_89], %133 {strides = array<i32>} : memref<2x1x1xf32, #tpu.memory_space<vmem>>, vector<1x1x1xf32>,
    %134 = vector.broadcast %112 : f32 to vector<1x1xf32>
    %c1_90 = arith.constant 1 : index
    %c0_91 = arith.constant 0 : index
    %c0_92 = arith.constant 0 : index
    %135 = vector.load %arg14[%c1_90, %c0_91, %c0_92] : memref<2x1x1xf32, #tpu.memory_space<vmem>>, vector<1x1x1xf32>
    %136 = vector.shape_cast %135 : vector<1x1x1xf32> to vector<1x1xf32>
    %137 = vector.shape_cast %134 : vector<1x1xf32> to vector<1x1x1xf32>
    tpu.vector_store %arg14[%c1_90, %c0_91, %c0_92], %137 {strides = array<i32>} : memref<2x1x1xf32, #tpu.memory_space<vmem>>, vector<1x1x1xf32>,
    return
  }
  func.func @transform_0(%arg0: i32) -> (i32, i32, i32) {
    %c0_i32 = arith.constant 0 : i32
    %c0_i32_0 = arith.constant 0 : i32
    %c0_i32_1 = arith.constant 0 : i32
    return %arg0, %c0_i32, %c0_i32_0 : i32, i32, i32
  }
  func.func @transform_1(%arg0: i32) -> (i32, i32, i32) {
    %c0_i32 = arith.constant 0 : i32
    %c0_i32_0 = arith.constant 0 : i32
    %c0_i32_1 = arith.constant 0 : i32
    return %arg0, %c0_i32, %c0_i32_0 : i32, i32, i32
  }
  func.func @transform_2(%arg0: i32) -> (i32, i32, i32) {
    %c0_i32 = arith.constant 0 : i32
    %c0_i32_0 = arith.constant 0 : i32
    %c0_i32_1 = arith.constant 0 : i32
    return %arg0, %c0_i32, %c0_i32_0 : i32, i32, i32
  }
  func.func @transform_3(%arg0: i32) -> (i32, i32, i32) {
    %c0_i32 = arith.constant 0 : i32
    %c0_i32_0 = arith.constant 0 : i32
    %c0_i32_1 = arith.constant 0 : i32
    return %arg0, %c0_i32, %c0_i32_0 : i32, i32, i32
  }
  func.func @transform_4(%arg0: i32) -> (i32, i32, i32) {
    %c0_i32 = arith.constant 0 : i32
    %c0_i32_0 = arith.constant 0 : i32
    %c0_i32_1 = arith.constant 0 : i32
    return %arg0, %c0_i32, %c0_i32_0 : i32, i32, i32
  }
  func.func @transform_5(%arg0: i32) -> (i32, i32, i32) {
    %c0_i32 = arith.constant 0 : i32
    %c0_i32_0 = arith.constant 0 : i32
    %c0_i32_1 = arith.constant 0 : i32
    return %arg0, %c0_i32, %c0_i32_0 : i32, i32, i32
  }
  func.func @transform_6(%arg0: i32) -> (i32, i32, i32) {
    %c0_i32 = arith.constant 0 : i32
    %c0_i32_0 = arith.constant 0 : i32
    %c0_i32_1 = arith.constant 0 : i32
    return %arg0, %c0_i32, %c0_i32_0 : i32, i32, i32
  }
  func.func @transform_7(%arg0: i32) -> (i32, i32, i32) {
    %c0_i32 = arith.constant 0 : i32
    %c0_i32_0 = arith.constant 0 : i32
    %c0_i32_1 = arith.constant 0 : i32
    return %arg0, %c0_i32, %c0_i32_0 : i32, i32, i32
  }
  func.func @transform_8(%arg0: i32) -> (i32, i32, i32) {
    %c0_i32 = arith.constant 0 : i32
    %c0_i32_0 = arith.constant 0 : i32
    %c0_i32_1 = arith.constant 0 : i32
    return %arg0, %c0_i32, %c0_i32_0 : i32, i32, i32
  }
  func.func @transform_9(%arg0: i32) -> (i32, i32, i32) {
    %c0_i32 = arith.constant 0 : i32
    %c0_i32_0 = arith.constant 0 : i32
    %c0_i32_1 = arith.constant 0 : i32
    return %arg0, %c0_i32, %c0_i32_0 : i32, i32, i32
  }
  func.func @transform_10(%arg0: i32) -> (i32, i32, i32) {
    %c0_i32 = arith.constant 0 : i32
    %c0_i32_0 = arith.constant 0 : i32
    %c0_i32_1 = arith.constant 0 : i32
    return %arg0, %c0_i32, %c0_i32_0 : i32, i32, i32
  }
  func.func @transform_11(%arg0: i32) -> (i32, i32, i32) {
    %c0_i32 = arith.constant 0 : i32
    %c0_i32_0 = arith.constant 0 : i32
    %c0_i32_1 = arith.constant 0 : i32
    return %arg0, %c0_i32, %c0_i32_0 : i32, i32, i32
  }
  func.func @transform_12(%arg0: i32) -> (i32, i32, i32) {
    %c0_i32 = arith.constant 0 : i32
    %c0_i32_0 = arith.constant 0 : i32
    %c0_i32_1 = arith.constant 0 : i32
    return %arg0, %c0_i32, %c0_i32_0 : i32, i32, i32
  }
  func.func @transform_13(%arg0: i32) -> (i32, i32, i32) {
    %c0_i32 = arith.constant 0 : i32
    %c0_i32_0 = arith.constant 0 : i32
    %c0_i32_1 = arith.constant 0 : i32
    return %arg0, %c0_i32, %c0_i32_0 : i32, i32, i32
  }
}

</mosaic_0001>

<bundles_post_ra>
// kernel: tpu_custom_call.1
= control target key start
LH: loop header
LB: loop body
LE: loop exit
PB: predicated region body
PF: predicated region fallthrough
CT: control target
= control target key end

     0   :  { %19 = vsyncpa [#allocation3], 0  ;;  %s2139_s0 = inlined_call_operand.vmem [shape: f32[2,64,1], index: 0, kind: input, shape index: {}]   ;;  %s2140_s1 = inlined_call_operand.vmem [shape: f32[2,64,1], index: 1, kind: input, shape index: {}]   ;;  %s2141_s2 = inlined_call_operand.vmem [shape: f32[2,1,64], index: 2, kind: input, shape index: {}]   ;;  %s2142_s3 = inlined_call_operand.hbm [shape: f32[2,1,64], index: 3, kind: input, shape index: {}]   ;;  %s2143_s4 = inlined_call_operand.vmem [shape: f32[2,1,1], index: 4, kind: input, shape index: {}]   ;;  %s2144_s5 = inlined_call_operand.vmem [shape: f32[2,32,64], index: 5, kind: input, shape index: {}]   ;;  %s2145_s6 = inlined_call_operand.vmem [shape: f32[2,32,64], index: 6, kind: input, shape index: {}]   ;;  %s2146_s7 = inlined_call_operand.vmem [shape: f32[2,32,64], index: 7, kind: input, shape index: {}]   ;;  %s2147_s8 = inlined_call_operand.vmem [shape: f32[2,32,64], index: 8, kind: input, shape index: {}]   ;;  %s2148_s9 = inlined_call_operand.hbm [shape: f32[2,64,64], index: 9, kind: output, shape index: {0}]   ;;  %s2149_s10 = inlined_call_operand.hbm [shape: f32[2,64,64], index: 10, kind: output, shape index: {1}]   ;;  %s2150_s11 = inlined_call_operand.vmem [shape: f32[2,1,1], index: 11, kind: output, shape index: {2}]   ;;  %s2151_s12 = inlined_call_operand.vmem [shape: f32[2,1,1], index: 12, kind: output, shape index: {3}]   ;;  %s2152_s13 = inlined_call_operand.vmem [shape: f32[2,1,1], index: 13, kind: output, shape index: {4}]  }
   0x1   :  { %20 = vsyncpa [#allocation4], 0 }
   0x2   :  { %21 = vsyncpa [#allocation7], 0  ;;  %s32_s27 = sshll.u32 %s2142_s3, 4  ;;  %s1502_s28 = smov [#allocation2]   ;;  %s33_s27 = int_to_ptr.hbm [resolvable:$true] %s32_s27 }
   0x3   :  { %s34_s29 = sshll.u32 %s1502_s28, 4  ;;  %s1503_s30 = smov 16   ;;  %s35_s29 = int_to_ptr.vmem [resolvable:$true] %s34_s29 }
   0x4   :  { %s1504_s14 = smov 1  }
   0x5   :  { %40 = dma.hbm_to_vmem [thread:$0]  %s33_s27, 32, %s35_s29, [#allocation3], %s1503_s30, %s1503_s30, %s1504_s14  }
   0x6   :  { %1496 = dma.done.wait [#allocation3], 32  }
   0x7   :  { %1497 = vsyncadd [#allocation3], 4294967264  ;;  %v1505_v0 = vmov 0   ;;  %v1295_v1 = vld [vmem:[%s2144_s5 + $0x20] sm:$0xff]  ;;  %v1296_v4 = vld [vmem:[%s2144_s5 + $0x28] sm:$0xff]  ;;  %vm319_vm0 = vcmask 261120  }
   0x8   :  { %1355 = vset.pattern.permute.xlu2 %v1505_v0  ;;  %v385_v2 = vld [vmem:[%s2147_s8] sm:$0xff]  ;;  %860 = vxpose.xlu1.b32.start [1/4] (short) (narrow) %v1295_v1, 64  ;;  %v386_v5 = vld [vmem:[%s2147_s8 + $0x8] sm:$0xff]  ;;  %v1297_v7 = vld [vmem:[%s2144_s5 + $0x30] sm:$0xff]  ;;  %vm230_vm1 = vcmask 523264   ;;  %s1202_s20 = sshll.u32 %s2148_s9, 4  ;;  %s1203_s20 = int_to_ptr.hbm [resolvable:$true] %s1202_s20 }
   0x9   :  { %v59_v3 = vld [vmem:[%s2139_s0 + $0x20] sm:$0xff]  ;;  %393 = vxpose.xlu0.b32.start [1/4] (short) (narrow) %v385_v2, 64  ;;  %v60_v6 = vld [vmem:[%s2139_s0 + $0x28] sm:$0xff]  ;;  %v387_v8 = vld [vmem:[%s2147_s8 + $0x10] sm:$0xff]  ;;  %s1508_s21 = smov 128  }
   0xa   :  { %86 = vperm.xlu2 %1355, %v59_v3   ;;  %v115_v9 = vld [vmem:[%s2140_s1] sm:$0xff]  ;;  %v1298_v10 = vld [vmem:[%s2144_s5 + $0x38] sm:$0xff]  ;;  %v280_v14 = vld [vmem:[%s2144_s5 + $0x8] sm:$0xff] }
   0xb   :  { %v388_v11 = vld [vmem:[%s2147_s8 + $0x18] sm:$0xff]  ;;  %v279_v13 = vld [vmem:[%s2144_s5] sm:$0xff]  ;;  %v281_v15 = vld [vmem:[%s2144_s5 + $0x10] sm:$0xff] }
   0xc   :  { %v118_v12 = vld [vmem:[%s2140_s1 + $0x18] sm:$0xff]  ;;  %v391_v18 = vld [vmem:[%s2146_s7 + $0x10] sm:$0xff]  ;;  %v1311_v19 = vld [vmem:[%s2147_s8 + $0x20] sm:$0xff] }
   0xd   :  { %v282_v16 = vld [vmem:[%s2144_s5 + $0x18] sm:$0xff]  ;;  %v390_v20 = vld [vmem:[%s2146_s7 + $0x8] sm:$0xff]  ;;  %v389_v21 = vld [vmem:[%s2146_s7] sm:$0xff] }
   0xe   :  { %v392_v17 = vld [vmem:[%s2146_s7 + $0x18] sm:$0xff]  ;;  %v1312_v22 = vld [vmem:[%s2147_s8 + $0x28] sm:$0xff]  ;;  %v1313_v23 = vld [vmem:[%s2147_s8 + $0x30] sm:$0xff] }
   0xf   :  { %461 = vmatpush.msra.mxu1 %v392_v17  ;;  %v57_v24 = vld [vmem:[%s2139_s0 + $0x10] sm:$0xff]  ;;  %v1314_v25 = vld [vmem:[%s2147_s8 + $0x38] sm:$0xff]  ;;  %v55_v28 = vld [vmem:[%s2139_s0] sm:$0xff] }
  0x10   :  { %861 = vxpose.xlu1.b32.cont [2/4] (short) (narrow) %v1296_v4, 64  ;;  %v58_v26 = vld [vmem:[%s2139_s0 + $0x18] sm:$0xff]  ;;  %v1301_v32 = vld [vmem:[%s2145_s6 + $0x30] sm:$0xff]  ;;  %v1300_v34 = vld [vmem:[%s2145_s6 + $0x28] sm:$0xff] }
  0x11   :  { %394 = vxpose.xlu0.b32.cont [2/4] (short) (narrow) %v386_v5, 64  ;;  %462 = vmatpush.msra.mxu1 %v391_v18  ;;  %v62_v27 = vld [vmem:[%s2139_s0 + $0x38] sm:$0xff]  ;;  %v117_v33 = vld [vmem:[%s2140_s1 + $0x10] sm:$0xff]  ;;  %v56_v35 = vld [vmem:[%s2139_s0 + $0x8] sm:$0xff] }
  0x12   :  { %91 = vperm.xlu2 %1355, %v60_v6   ;;  %v1302_v31 = vld [vmem:[%s2145_s6 + $0x38] sm:$0xff]  ;;  %v1299_v38 = vld [vmem:[%s2145_s6 + $0x20] sm:$0xff]  ;;  %v120_v40 = vld [vmem:[%s2140_s1 + $0x28] sm:$0xff] }
  0x13   :  { %463 = vmatpush.msra.mxu1 %v390_v20  ;;  %928 = vmatpush.msra.mxu2 %v1302_v31  ;;  %v286_v39 = vld [vmem:[%s2145_s6 + $0x18] sm:$0xff]  ;;  %v285_v42 = vld [vmem:[%s2145_s6 + $0x10] sm:$0xff]  ;;  %v284_v46 = vld [vmem:[%s2145_s6 + $0x8] sm:$0xff] }
  0x14   :  { %356 = vmatpush.msra.mxu0 %v286_v39  ;;  %v61_v43 = vld [vmem:[%s2139_s0 + $0x30] sm:$0xff]  ;;  %v283_v47 = vld [vmem:[%s2145_s6] sm:$0xff]  ;;  %v116_v49 = vld [vmem:[%s2140_s1 + $0x8] sm:$0xff]  ;;  %s1507_s6 = smov [#allocation5]  }
  0x15   :  { %464 = vmatpush.msra.mxu1 %v389_v21  ;;  %929 = vmatpush.msra.mxu2 %v1301_v32  ;;  %v121_v48 = vld [vmem:[%s2140_s1 + $0x30] sm:$0xff]  ;;  %v122_v53 = vld [vmem:[%s2140_s1 + $0x38] sm:$0xff]  ;;  %v119_v54 = vld [vmem:[%s2140_s1 + $0x20] sm:$0xff] }
  0x16   :  { %357 = vmatpush.msra.mxu0 %v285_v42  ;;  %v1270_v57 = vld [vmem:[%s2139_s0 + $0x48] sm:$0xff]  ;;  %v1416_v59 = vld [vmem:[%s2143_s4] ss:$0 sm:$0xff]  ;;  %v1280_v2 = vld [vmem:[%s2140_s1 + $0x50] sm:$0xff] }
  0x17   :  { %930 = vmatpush.msra.mxu2 %v1300_v34  ;;  %v1279_v61 = vld [vmem:[%s2140_s1 + $0x48] sm:$0xff]  ;;  %v1278_v4 = vld [vmem:[%s2140_s1 + $0x40] sm:$0xff]  ;;  %v1317_v17 = vld [vmem:[%s2146_s7 + $0x30] sm:$0xff] }
  0x18   :  { %862 = vxpose.xlu1.b32.cont [3/4] (short) (narrow) %v1297_v7, 64  ;;  %358 = vmatpush.msra.mxu0 %v284_v46  ;;  %v1281_v7 = vld [vmem:[%s2140_s1 + $0x58] sm:$0xff]  ;;  %v1273_v18 = vld [vmem:[%s2139_s0 + $0x60] sm:$0xff]  ;;  %v1275_v20 = vld [vmem:[%s2139_s0 + $0x70] sm:$0xff] }
  0x19   :  { %395 = vxpose.xlu0.b32.cont [3/4] (short) (narrow) %v387_v8, 64  ;;  %931 = vmatpush.msra.mxu2 %v1299_v38  ;;  %v1315_v21 = vld [vmem:[%s2146_s7 + $0x20] sm:$0xff] }
  0x1a   :  { %126 = vperm.xlu2 %1355, %v115_v9   ;;  %359 = vmatpush.msra.mxu0 %v283_v47  ;;  %v1271_v9 = vld [vmem:[%s2139_s0 + $0x50] sm:$0xff]  ;;  %v1415_v47 = vld [vmem:[#allocation2] ss:$0 sm:$0xff] }
  0x20   :  { %863 = vxpose.xlu1.b32.end [4/4] (short) (narrow) %v1298_v10, 64 }
  0x21   :  { %396 = vxpose.xlu0.b32.end [4/4] (short) (narrow) %v388_v11, 64  ;;  %v1282_v11 = vld [vmem:[%s2140_s1 + $0x60] sm:$0xff] }
  0x22   :  { %141 = vperm.xlu2 %1355, %v118_v12  }
  0x48   :  { %287 = vxpose.xlu2.b32.start [1/4] (short) (narrow) %v279_v13, 64  ;;  %v1272_v13 = vld [vmem:[%s2139_s0 + $0x58] sm:$0xff] }
  0x50   :  { %288 = vxpose.xlu2.b32.cont [2/4] (short) (narrow) %v280_v14, 64  ;;  %v1274_v14 = vld [vmem:[%s2139_s0 + $0x68] sm:$0xff] }
  0x58   :  { %289 = vxpose.xlu2.b32.cont [3/4] (short) (narrow) %v281_v15, 64 }
  0x60   :  { %290 = vxpose.xlu2.b32.end [4/4] (short) (narrow) %v282_v16, 64  ;;  %v1318_v16 = vld [vmem:[%s2146_s7 + $0x38] sm:$0xff] }
  0x61   :  { %1035 = vmatpush.msra.mxu3 %v1318_v16 }
  0x63   :  { %1036 = vmatpush.msra.mxu3 %v1317_v17 }
  0x64   :  { %v1695_v41 = vpop.permute.xlu2 %86 }
  0x6c   :  { %v1717_v50 = vpop.permute.xlu2 %91 }
  0x73   :  { %1357 = vset.pattern.permute.xlu1 %v1505_v0 }
  0x74   :  { %v1728_v56 = vpop.permute.xlu2 %126 }
  0x7c   :  { %v1742_v62 = vpop.permute.xlu2 %141 }
  0x88   :  { %967 = vxpose.xlu2.b32.start [1/4] (short) (narrow) %v1311_v19, 64  ;;  %1356 = vset.pattern.permute.xlu0 %v1505_v0  ;;  %v1269_v0 = vld [vmem:[%s2139_s0 + $0x40] sm:$0xff]  ;;  %v1316_v19 = vld [vmem:[%s2146_s7 + $0x28] sm:$0xff]  ;;  %s1200_s7 = sshll.u32 %s1507_s6, 4  ;;  %s1201_s7 = int_to_ptr.vmem [resolvable:$true] %s1200_s7 }
  0x89   :  { %1037 = vmatpush.msra.mxu3 %v1316_v19 }
  0x8b   :  { %1038 = vmatpush.msra.mxu3 %v1315_v21 }
  0x90   :  { %968 = vxpose.xlu2.b32.cont [2/4] (short) (narrow) %v1312_v22, 64 }
  0x98   :  { %969 = vxpose.xlu2.b32.cont [3/4] (short) (narrow) %v1313_v23, 64  ;;  %v1417_v23 = vld [vmem:[%s2143_s4 + $0x1] ss:$0 sm:$0xff]  ;;  %s1509_s4 = smov 8  }
  0x9a   :  { %76 = vperm.xlu1 %1357, %v57_v24   ;;  %v1276_v24 = vld [vmem:[%s2139_s0 + $0x78] sm:$0xff] }
  0xa0   :  { %970 = vxpose.xlu2.b32.end [4/4] (short) (narrow) %v1314_v25, 64 }
  0xa2   :  { %81 = vperm.xlu1 %1357, %v58_v26   ;;  %v1283_v26 = vld [vmem:[%s2140_s1 + $0x68] sm:$0xff] }
  0xaa   :  { %101 = vperm.xlu1 %1357, %v62_v27  }
  0xac   :  { %v876_v30 = vpop.trf.xlu1 }
  0xad   :  { %v409_v29 = vpop.trf.xlu0  ;;  %1303 = vmatmul.msk.f32.vlgmr.msra.gmra.mxu2 %vm319_vm0, %v876_v30 }
  0xae   :  { %1261 = vmatmul.msk.f32.vlgmr.msra.gmra.mxu1 %vm319_vm0, %v409_v29  ;;  %v1284_v29 = vld [vmem:[%s2140_s1 + $0x70] sm:$0xff] }
  0xaf   :  { %66 = vperm.xlu0 %1356, %v55_v28  }
  0xb2   :  { %136 = vperm.xlu1 %1357, %v117_v33  }
  0xb4   :  { %v877_v37 = vpop.trf.xlu1 }
  0xb5   :  { %v410_v36 = vpop.trf.xlu0  ;;  %1304 = vmatmul.msk.f32.gmra.mxu2 %vm319_vm0, %v877_v37 }
  0xb6   :  { %1262 = vmatmul.msk.f32.gmra.mxu1 %vm319_vm0, %v410_v36 }
  0xb7   :  { %71 = vperm.xlu0 %1356, %v56_v35  }
  0xba   :  { %151 = vperm.xlu1 %1357, %v120_v40  }
  0xbc   :  { %v878_v45 = vpop.trf.xlu1 }
  0xbd   :  { %v411_v44 = vpop.trf.xlu0  ;;  %1305 = vmatmul.msk.f32.gmra.mxu2 %vm319_vm0, %v878_v45 }
  0xbe   :  { %1263 = vmatmul.msk.f32.gmra.mxu1 %vm319_vm0, %v411_v44 }
  0xbf   :  { %96 = vperm.xlu0 %1356, %v61_v43  }
  0xc2   :  { %156 = vperm.xlu1 %1357, %v121_v48  }
  0xc4   :  { %v879_v52 = vpop.trf.xlu1 }
  0xc5   :  { %v412_v51 = vpop.trf.xlu0  ;;  %1306 = vmatmul.msk.f32.gmra.mxu2 %vm319_vm0, %v879_v52 }
  0xc6   :  { %1264 = vmatmul.msk.f32.gmra.mxu1 %vm319_vm0, %v412_v51  ;;  %v167_v51 = vsub.f32 %v1728_v56, %v1415_v47 }
  0xc7   :  { %131 = vperm.xlu0 %1356, %v116_v49   ;;  %v1414_v49 = vld [vmem:[%s2141_s2] ss:$0 sm:$0xff] }
  0xca   :  { %161 = vperm.xlu1 %1357, %v122_v53  }
  0xcc   :  { %v880_v58 = vpop.trf.xlu1 }
  0xcd   :  { %v413_v55 = vpop.trf.xlu0  ;;  %1307 = vmatmul.msk.f32.gmra.mxu2 %vm319_vm0, %v880_v58 }
  0xce   :  { %1265 = vmatmul.msk.f32.gmra.mxu1 %vm319_vm0, %v413_v55 }
  0xcf   :  { %146 = vperm.xlu0 %1356, %v119_v54  }
  0xd2   :  { %638 = vperm.xlu1 %1357, %v1270_v57   ;;  %v170_v57 = vsub.f32 %v1742_v62, %v1415_v47 }
  0xd4   :  { %v881_v63 = vpop.trf.xlu1  ;;  %v186_v62 = vmul.f32 %v170_v57, %v170_v57 }
  0xd5   :  { %v414_v60 = vpop.trf.xlu0  ;;  %1308 = vmatmul.msk.f32.gmra.mxu2 %vm319_vm0, %v881_v63 }
  0xd6   :  { %1266 = vmatmul.msk.f32.gmra.mxu1 %vm319_vm0, %v414_v60 }
  0xd7   :  { %203 = vperm.xlu0 %1356, %v1416_v59  }
  0xda   :  { %700 = vperm.xlu1 %1357, %v1279_v61   ;;  %v111_v61 = vsub.f32 %v1695_v41, %v1414_v49 }
  0xdc   :  { %v882_v6 = vpop.trf.xlu1 }
  0xdd   :  { %v415_v1 = vpop.trf.xlu0  ;;  %1309 = vmatmul.msk.f32.gmra.mxu2 %vm319_vm0, %v882_v6 }
  0xde   :  { %1267 = vmatmul.msk.f32.gmra.mxu1 %vm319_vm0, %v415_v1  ;;  %v112_v1 = vsub.f32 %v1717_v50, %v1414_v49 }
  0xdf   :  { %633 = vperm.xlu0 %1356, %v1269_v0  }
  0xe0   :  { %v180_v50 = vmul.f32 %v112_v1, %v112_v1 }
  0xe1   :  { %v303_v3 = vpop.trf.xlu2 }
  0xe2   :  { %1253 = vmatmul.msk.f32.vlgmr.msra.gmra.mxu0 %vm319_vm0, %v303_v3  ;;  %705 = vperm.xlu1 %1357, %v1280_v2   ;;  %v183_v2 = vmul.f32 %v167_v51, %v167_v51 }
  0xe4   :  { %v883_v10 = vpop.trf.xlu1 }
  0xe5   :  { %v416_v5 = vpop.trf.xlu0  ;;  %1310 = vmatmul.msk.f32.gmra.mxu2 %vm319_vm0, %v883_v10 }
  0xe6   :  { %1268 = vmatmul.msk.f32.gmra.mxu1 %vm319_vm0, %v416_v5 }
  0xe7   :  { %695 = vperm.xlu0 %1356, %v1278_v4  }
  0xe9   :  { %v304_v8 = vpop.trf.xlu2 }
  0xea   :  { %1254 = vmatmul.msk.f32.gmra.mxu0 %vm319_vm0, %v304_v8  ;;  %710 = vperm.xlu1 %1357, %v1281_v7  }
  0xef   :  { %643 = vperm.xlu0 %1356, %v1271_v9  }
  0xf1   :  { %v305_v12 = vpop.trf.xlu2 }
  0xf2   :  { %1255 = vmatmul.msk.f32.gmra.mxu0 %vm319_vm0, %v305_v12  ;;  %715 = vperm.xlu1 %1357, %v1282_v11  }
  0xf7   :  { %648 = vperm.xlu0 %1356, %v1272_v13  }
  0xf9   :  { %v306_v15 = vpop.trf.xlu2 }
  0xfa   :  { %1256 = vmatmul.msk.f32.gmra.mxu0 %vm319_vm0, %v306_v15  ;;  %658 = vperm.xlu1 %1357, %v1274_v14   ;;  %v179_v15 = vmul.f32 %v111_v61, %v111_v61 }
  0xff   :  { %653 = vperm.xlu0 %1356, %v1273_v18  }
 0x101   :  { %v307_v22 = vpop.trf.xlu2 }
 0x102   :  { %1257 = vmatmul.msk.f32.gmra.mxu0 %vm319_vm0, %v307_v22  ;;  %663 = vperm.xlu1 %1357, %v1275_v20  }
 0x107   :  { %773 = vperm.xlu0 %1356, %v1417_v23  }
 0x109   :  { %v308_v25 = vpop.trf.xlu2 }
 0x10a   :  { %1258 = vmatmul.msk.f32.gmra.mxu0 %vm319_vm0, %v308_v25  ;;  %668 = vperm.xlu1 %1357, %v1276_v24  }
 0x10c   :  { %v77_v27 = vpop.permute.xlu1 %76 }
 0x10d   :  { %v109_v58 = vsub.f32 %v77_v27, %v1414_v49 }
 0x10f   :  { %720 = vperm.xlu0 %1356, %v1283_v26   ;;  %v177_v9 = vmul.f32 %v109_v58, %v109_v58 }
 0x111   :  { %v309_v28 = vpop.trf.xlu2 }
 0x112   :  { %1259 = vmatmul.msk.f32.gmra.mxu0 %vm319_vm0, %v309_v28 }
 0x114   :  { %v82_v30 = vpop.permute.xlu1 %81 }
 0x115   :  { %v110_v53 = vsub.f32 %v82_v30, %v1414_v49  ;;  %v1506_v30 = vmov 0.0  }
 0x117   :  { %725 = vperm.xlu0 %1356, %v1284_v29   ;;  %v178_v4 = vmul.f32 %v110_v53, %v110_v53 }
 0x119   :  { %v310_v31 = vpop.trf.xlu2  ;;  %v194_v17 = vadd.f32 %v186_v62, %v178_v4 }
 0x11a   :  { %1260 = vmatmul.msk.f32.gmra.mxu0 %vm319_vm0, %v310_v31 }
 0x11c   :  { %v102_v32 = vpop.permute.xlu1 %101 }
 0x11d   :  { %v114_v5 = vsub.f32 %v102_v32, %v1414_v49 }
 0x11f   :  { %v182_v18 = vmul.f32 %v114_v5, %v114_v5 }
 0x121   :  { %v983_v33 = vpop.trf.xlu2  ;;  %v67_v34 = vpop.permute.xlu0 %66 }
 0x122   :  { %1319 = vmatmul.msk.f32.vlgmr.msra.gmra.mxu3 %vm319_vm0, %v983_v33  ;;  %v107_v54 = vsub.f32 %v67_v34, %v1414_v49 }
 0x124   :  { %v137_v35 = vpop.permute.xlu1 %136  ;;  %v175_v6 = vmul.f32 %v107_v54, %v107_v54 }
 0x125   :  { %v169_v55 = vsub.f32 %v137_v35, %v1415_v47 }
 0x126   :  { %v191_v19 = vadd.f32 %v183_v2, %v175_v6 }
 0x127   :  { %v185_v7 = vmul.f32 %v169_v55, %v169_v55 }
 0x129   :  { %v984_v36 = vpop.trf.xlu2  ;;  %v72_v37 = vpop.permute.xlu0 %71  ;;  %v193_v20 = vadd.f32 %v185_v7, %v177_v9 }
 0x12a   :  { %1320 = vmatmul.msk.f32.gmra.mxu3 %vm319_vm0, %v984_v36  ;;  %v108_v3 = vsub.f32 %v72_v37, %v1414_v49 }
 0x12b   :  { %v1813_v38 = vpop.f32.mrf.mxu1 }
 0x12c   :  { %v152_v39 = vpop.permute.xlu1 %151  ;;  %v176_v16 = vmul.f32 %v108_v3, %v108_v3 }
 0x12d   :  { %v172_v59 = vsub.f32 %v152_v39, %v1415_v47 }
 0x12f   :  { %v188_v10 = vmul.f32 %v172_v59, %v172_v59 }
 0x131   :  { %v985_v40 = vpop.trf.xlu2  ;;  %v97_v42 = vpop.permute.xlu0 %96  ;;  %v196_v21 = vadd.f32 %v188_v10, %v180_v50 }
 0x132   :  { %1321 = vmatmul.msk.f32.gmra.mxu3 %vm319_vm0, %v985_v40  ;;  %v113_v12 = vsub.f32 %v97_v42, %v1414_v49 }
 0x133   :  { %v1816_v43 = vpop.f32.mrf.mxu1 }
 0x134   :  { %v157_v44 = vpop.permute.xlu1 %156  ;;  %v181_v24 = vmul.f32 %v113_v12, %v113_v12 }
 0x135   :  { %v173_v41 = vsub.f32 %v157_v44, %v1415_v47 }
 0x137   :  { %v189_v25 = vmul.f32 %v173_v41, %v173_v41 }
 0x139   :  { %v986_v45 = vpop.trf.xlu2  ;;  %v132_v46 = vpop.permute.xlu0 %131  ;;  %v197_v40 = vadd.f32 %v189_v25, %v181_v24 }
 0x13a   :  { %1322 = vmatmul.msk.f32.gmra.mxu3 %vm319_vm0, %v986_v45  ;;  %v168_v60 = vsub.f32 %v132_v46, %v1415_v47 }
 0x13b   :  { %v1819_v48 = vpop.f32.mrf.mxu1 }
 0x13c   :  { %v162_v52 = vpop.permute.xlu1 %161  ;;  %v184_v11 = vmul.f32 %v168_v60, %v168_v60 }
 0x13d   :  { %v174_v13 = vsub.f32 %v162_v52, %v1415_v47 }
 0x13e   :  { %v192_v22 = vadd.f32 %v184_v11, %v176_v16 }
 0x13f   :  { %v190_v26 = vmul.f32 %v174_v13, %v174_v13 }
 0x141   :  { %v987_v63 = vpop.trf.xlu2  ;;  %v147_v0 = vpop.permute.xlu0 %146  ;;  %v198_v42 = vadd.f32 %v190_v26, %v182_v18 }
 0x142   :  { %1323 = vmatmul.msk.f32.gmra.mxu3 %vm319_vm0, %v987_v63  ;;  %v171_v56 = vsub.f32 %v147_v0, %v1415_v47 }
 0x143   :  { %v475_v8 = vpop.f32.mrf.mxu1 }
 0x144   :  { %v187_v14 = vmul.f32 %v171_v56, %v171_v56  ;;  %v1829_v23 = vpop.permute.xlu1 %638 }
 0x146   :  { %v195_v27 = vadd.f32 %v187_v14, %v179_v15 }
 0x149   :  { %v988_v28 = vpop.trf.xlu2  ;;  %v204_v29 = vpop.permute.xlu0 %203 }
 0x14a   :  { %1324 = vmatmul.msk.f32.gmra.mxu3 %vm319_vm0, %v988_v28  ;;  %vm206_vm2 = vcmp.lt.f32.partialorder %v191_v19, %v204_v29  ;;  %vm207_vm3 = vcmp.lt.f32.partialorder %v192_v22, %v204_v29  ;;  %vm208_vm4 = vcmp.lt.f32.partialorder %v193_v20, %v204_v29  ;;  %vm209_vm5 = vcmp.lt.f32.partialorder %v194_v17, %v204_v29 }
 0x14b   :  { %vm210_vm6 = vcmp.lt.f32.partialorder %v195_v27, %v204_v29  ;;  %v1833_v31 = vsel %vm206_vm2, 1.0, %v1506_v30  ;;  %v1836_v32 = vsel %vm207_vm3, 1.0, %v1506_v30  ;;  %v1839_v33 = vsel %vm208_vm4, 1.0, %v1506_v30  ;;  %v478_v34 = vpop.f32.mrf.mxu1 }
 0x14c   :  { %v1842_v35 = vsel %vm209_vm5, 1.0, %v1506_v30  ;;  %v1845_v36 = vsel %vm210_vm6, 1.0, %v1506_v30  ;;  %231 = vst.msk [vmem:[#allocation5] sm:$0xff] %vm230_vm1, %v1833_v31  ;;  %v567_v37 = vmul.f32 %v1833_v31, %v1813_v38  ;;  %v568_v39 = vmul.f32 %v1836_v32, %v1816_v43  ;;  %v701_v60 = vpop.permute.xlu1 %700 }
 0x14d   :  { %232 = vst.msk [vmem:[#allocation5 + $0x8] sm:$0xff] %vm230_vm1, %v1836_v32  ;;  %v569_v44 = vmul.f32 %v1839_v33, %v1819_v48  ;;  %vm211_vm7 = vcmp.lt.f32.partialorder %v196_v21, %v204_v29  ;;  %v570_v45 = vmul.f32 %v1842_v35, %v475_v8  ;;  %v571_v47 = vmul.f32 %v1845_v36, %v478_v34  ;;  %v1911_v34 = vpop.f32.mrf.mxu2 }
 0x14e   :  { %233 = vst.msk [vmem:[#allocation5 + $0x10] sm:$0xff] %vm230_vm1, %v1839_v33  ;;  %v575_v46 = vsel %vm230_vm1, %v567_v37, 0.0  ;;  %v576_v38 = vsel %vm230_vm1, %v568_v39, 0.0  ;;  %v1863_v43 = vsel %vm211_vm7, 1.0, %v1506_v30  ;;  %vm212_vm8 = vcmp.lt.f32.partialorder %v197_v40, %v204_v29  ;;  %v1914_v40 = vld [vmem:[#allocation2 + $0x1] ss:$0 sm:$0xff] }
 0x14f   :  { %234 = vst.msk [vmem:[#allocation5 + $0x18] sm:$0xff] %vm230_vm1, %v1842_v35  ;;  %v577_v49 = vadd.f32 %v576_v38, %v575_v46  ;;  %v578_v48 = vsel %vm230_vm1, %v569_v44, 0.0  ;;  %vm213_vm9 = vcmp.lt.f32.partialorder %v198_v42, %v204_v29  ;;  %v490_v51 = vsel %vm230_vm1, %v1833_v31, 0.0  ;;  %v1920_v44 = vld [vmem:[%s2141_s2 + $0x1] ss:$0 sm:$0xff] }
 0x150   :  { %235 = vst.msk [vmem:[#allocation5 + $0x20] sm:$0xff] %vm230_vm1, %v1845_v36  ;;  %v1878_v55 = vsel %vm212_vm8, 1.0, %v1506_v30  ;;  %v1881_v57 = vsel %vm213_vm9, 1.0, %v1506_v30  ;;  %v491_v58 = vsel %vm230_vm1, %v1836_v32, 0.0  ;;  %v580_v59 = vsel %vm230_vm1, %v570_v45, 0.0 }
 0x151   :  { %v579_v52 = vadd.f32 %v578_v48, %v577_v49  ;;  %v989_v53 = vpop.trf.xlu2  ;;  %v1873_v54 = vpop.permute.xlu0 %633  ;;  %236 = vst.msk [vmem:[#allocation5 + $0x28] sm:$0xff] %vm230_vm1, %v1863_v43  ;;  %v492_v61 = vadd.f32 %v491_v58, %v490_v51  ;;  %v493_v1 = vsel %vm230_vm1, %v1839_v33, 0.0  ;;  %v582_v2 = vsel %vm230_vm1, %v571_v47, 0.0 }
 0x152   :  { %1325 = vmatmul.msk.f32.gmra.mxu3 %vm319_vm0, %v989_v53  ;;  %237 = vst.msk [vmem:[#allocation5 + $0x30] sm:$0xff] %vm230_vm1, %v1878_v55  ;;  %v495_v5 = vsel %vm230_vm1, %v1842_v35, 0.0  ;;  %v497_v62 = vsel %vm230_vm1, %v1845_v36, 0.0  ;;  %v499_v12 = vsel %vm230_vm1, %v1863_v43, 0.0  ;;  %v501_v14 = vsel %vm230_vm1, %v1878_v55, 0.0 }
 0x153   :  { %v581_v63 = vadd.f32 %v580_v59, %v579_v52  ;;  %v481_v0 = vpop.f32.mrf.mxu1  ;;  %238 = vst.msk [vmem:[#allocation5 + $0x38] sm:$0xff] %vm230_vm1, %v1881_v57  ;;  %v494_v56 = vadd.f32 %v493_v1, %v492_v61  ;;  %v503_v16 = vsel %vm230_vm1, %v1881_v57, 0.0  ;;  %v737_v46 = vsub.f32 %v701_v60, %v1914_v40 }
 0x154   :  { %v572_v3 = vmul.f32 %v1863_v43, %v481_v0  ;;  %v706_v15 = vpop.permute.xlu1 %705  ;;  %v675_v53 = vsub.f32 %v1829_v23, %v1920_v44  ;;  %v674_v60 = vsub.f32 %v1873_v54, %v1920_v44  ;;  %v1285_v54 = vld [vmem:[%s2140_s1 + $0x78] sm:$0xff]  ;;  %vm565_vm3 = vcmask 0  }
 0x155   :  { %v583_v4 = vadd.f32 %v582_v2, %v581_v63  ;;  %v496_v7 = vadd.f32 %v495_v5, %v494_v56  ;;  %v738_v63 = vsub.f32 %v706_v15, %v1914_v40  ;;  %v936_v0 = vpop.f32.mrf.mxu2  ;;  %v753_v23 = vmul.f32 %v737_v46, %v737_v46 }
 0x156   :  { %v584_v6 = vsel %vm230_vm1, %v572_v3, 0.0 }
 0x157   :  { %v585_v8 = vadd.f32 %v584_v6, %v583_v4  ;;  %v498_v9 = vadd.f32 %v497_v62, %v496_v7  ;;  %v745_v62 = vmul.f32 %v675_v53, %v675_v53 }
 0x159   :  { %v696_v10 = vpop.permute.xlu0 %695  ;;  %v990_v11 = vpop.trf.xlu2  ;;  %v500_v41 = vadd.f32 %v499_v12, %v498_v9  ;;  %v744_v9 = vmul.f32 %v674_v60, %v674_v60 }
 0x15a   :  { %1326 = vmatmul.msk.f32.gmra.mxu3 %vm319_vm0, %v990_v11  ;;  %v736_v47 = vsub.f32 %v696_v10, %v1914_v40  ;;  %v754_v10 = vmul.f32 %v738_v63, %v738_v63 }
 0x15b   :  { %v484_v13 = vpop.f32.mrf.mxu1  ;;  %v502_v50 = vadd.f32 %v501_v14, %v500_v41 }
 0x15c   :  { %v573_v17 = vmul.f32 %v1878_v55, %v484_v13  ;;  %v711_v26 = vpop.permute.xlu1 %710  ;;  %v752_v5 = vmul.f32 %v736_v47, %v736_v47  ;;  %v761_v13 = vadd.f32 %v753_v23, %v745_v62 }
 0x15d   :  { %v504_v18 = vadd.f32 %v503_v16, %v502_v50  ;;  %v739_v3 = vsub.f32 %v711_v26, %v1914_v40 }
 0x15e   :  { %v586_v21 = vsel %vm230_vm1, %v573_v17, 0.0  ;;  %v760_v14 = vadd.f32 %v752_v5, %v744_v9 }
 0x15f   :  { %v361_v19 = vpop.f32.mrf.mxu0  ;;  %505 = vadd.xlane.f32.xlu2 %v504_v18  ;;  %v587_v25 = vadd.f32 %v586_v21, %v585_v8  ;;  %v755_v11 = vmul.f32 %v739_v3, %v739_v3 }
 0x160   :  { %v515_v42 = vmul.f32 %v1833_v31, %v361_v19 }
 0x161   :  { %v644_v20 = vpop.permute.xlu0 %643 }
 0x162   :  { %v523_v49 = vsel %vm230_vm1, %v515_v42, 0.0  ;;  %v676_v48 = vsub.f32 %v644_v20, %v1920_v44 }
 0x163   :  { %v487_v22 = vpop.f32.mrf.mxu1 }
 0x164   :  { %v574_v24 = vmul.f32 %v1881_v57, %v487_v22  ;;  %v716_v51 = vpop.permute.xlu1 %715  ;;  %v746_v6 = vmul.f32 %v676_v48, %v676_v48 }
 0x165   :  { %v740_v56 = vsub.f32 %v716_v51, %v1914_v40 }
 0x166   :  { %v588_v27 = vsel %vm230_vm1, %v574_v24, 0.0  ;;  %v762_v15 = vadd.f32 %v754_v10, %v746_v6  ;;  %v939_v24 = vpop.f32.mrf.mxu2 }
 0x167   :  { %v364_v28 = vpop.f32.mrf.mxu0  ;;  %v589_v29 = vadd.f32 %v588_v27, %v587_v25  ;;  %v756_v12 = vmul.f32 %v740_v56, %v740_v56 }
 0x168   :  { %v516_v39 = vmul.f32 %v1836_v32, %v364_v28 }
 0x169   :  { %590 = vadd.xlane.f32.xlu1 %v589_v29  ;;  %v649_v37 = vpop.permute.xlu0 %648 }
 0x16a   :  { %v524_v45 = vsel %vm230_vm1, %v516_v39, 0.0  ;;  %v677_v59 = vsub.f32 %v649_v37, %v1920_v44 }
 0x16b   :  { %v525_v58 = vadd.f32 %v524_v45, %v523_v49 }
 0x16c   :  { %v747_v7 = vmul.f32 %v677_v59, %v677_v59  ;;  %v659_v20 = vpop.permute.xlu1 %658 }
 0x16d   :  { %v679_v47 = vsub.f32 %v659_v20, %v1920_v44 }
 0x16e   :  { %v763_v16 = vadd.f32 %v755_v11, %v747_v7 }
 0x16f   :  { %v367_v38 = vpop.f32.mrf.mxu0  ;;  %v749_v56 = vmul.f32 %v679_v47, %v679_v47 }
 0x170   :  { %v517_v52 = vmul.f32 %v1839_v33, %v367_v38 }
 0x171   :  { %v654_v61 = vpop.permute.xlu0 %653 }
 0x172   :  { %v526_v1 = vsel %vm230_vm1, %v517_v52, 0.0  ;;  %v678_v2 = vsub.f32 %v654_v61, %v1920_v44 }
 0x173   :  { %v527_v4 = vadd.f32 %v526_v1, %v525_v58 }
 0x174   :  { %v748_v8 = vmul.f32 %v678_v2, %v678_v2  ;;  %v664_v23 = vpop.permute.xlu1 %663 }
 0x175   :  { %v680_v7 = vsub.f32 %v664_v23, %v1920_v44 }
 0x176   :  { %v764_v17 = vadd.f32 %v756_v12, %v748_v8 }
 0x177   :  { %v370_v41 = vpop.f32.mrf.mxu0  ;;  %730 = vperm.xlu2 %1355, %v1285_v54   ;;  %v750_v12 = vmul.f32 %v680_v7, %v680_v7 }
 0x178   :  { %v518_v50 = vmul.f32 %v1842_v35, %v370_v41 }
 0x179   :  { %v1942_v18 = vpop.permute.xlu0 %773 }
 0x17a   :  { %v528_v19 = vsel %vm230_vm1, %v518_v50, 0.0  ;;  %vm776_vm10 = vcmp.lt.f32.partialorder %v760_v14, %v1942_v18  ;;  %vm777_vm11 = vcmp.lt.f32.partialorder %v761_v13, %v1942_v18  ;;  %vm778_vm12 = vcmp.lt.f32.partialorder %v762_v15, %v1942_v18 }
 0x17b   :  { %v529_v21 = vadd.f32 %v528_v19, %v527_v4  ;;  %vm779_vm13 = vcmp.lt.f32.partialorder %v763_v16, %v1942_v18  ;;  %vm780_vm14 = vcmp.lt.f32.partialorder %v764_v17, %v1942_v18  ;;  %v1951_v22 = vsel %vm776_vm10, 1.0, %v1506_v30 }
 0x17c   :  { %v1954_v25 = vsel %vm777_vm11, 1.0, %v1506_v30  ;;  %v1957_v26 = vsel %vm778_vm12, 1.0, %v1506_v30  ;;  %v1960_v27 = vsel %vm779_vm13, 1.0, %v1506_v30  ;;  %801 = vst.msk [vmem:[#allocation5 + $0x40] sm:$0xff] %vm230_vm1, %v1951_v22  ;;  %v1965_v28 = vsel %vm780_vm14, 1.0, %v1506_v30 }
 0x17d   :  { %802 = vst.msk [vmem:[#allocation5 + $0x48] sm:$0xff] %vm230_vm1, %v1954_v25  ;;  %v1089_v29 = vmul.f32 %v1951_v22, %v1911_v34  ;;  %v1090_v37 = vmul.f32 %v1954_v25, %v936_v0  ;;  %v1091_v39 = vmul.f32 %v1957_v26, %v939_v24  ;;  %v1064_v42 = vsel %vm230_vm1, %v1951_v22, 0.0 }
 0x17e   :  { %803 = vst.msk [vmem:[#allocation5 + $0x50] sm:$0xff] %vm230_vm1, %v1957_v26  ;;  %v1065_v45 = vsel %vm230_vm1, %v1954_v25, 0.0  ;;  %v1067_v58 = vsel %vm230_vm1, %v1957_v26, 0.0  ;;  %v1358_v63 = vpack.i.bf16 %v1951_v22, %v1833_v31  ;;  %v1360_v2 = vpack.i.bf16 %v1954_v25, %v1836_v32 }
 0x17f   :  { %804 = vst.msk [vmem:[#allocation5 + $0x58] sm:$0xff] %vm230_vm1, %v1960_v27  ;;  %v1097_v46 = vsel %vm230_vm1, %v1089_v29, 0.0  ;;  %v1098_v34 = vsel %vm230_vm1, %v1090_v37, 0.0  ;;  %v373_v38 = vpop.f32.mrf.mxu0  ;;  %v1100_v51 = vsel %vm230_vm1, %v1091_v39, 0.0  ;;  %v1066_v53 = vadd.f32 %v1065_v45, %v1064_v42 }
 0x180   :  { %805 = vst.msk [vmem:[#allocation5 + $0x60] sm:$0xff] %vm230_vm1, %v1965_v28  ;;  %v1099_v49 = vadd.f32 %v1098_v34, %v1097_v46  ;;  %v519_v48 = vmul.f32 %v1845_v36, %v373_v38  ;;  %v1362_v3 = vpack.i.bf16 %v1957_v26, %v1839_v33 }
 0x181   :  { %v721_v52 = vpop.permute.xlu0 %720  ;;  %v1996_v1 = vadd.f32 %v1067_v58, %v1066_v53 }
 0x182   :  { %v1990_v59 = vadd.f32 %v1100_v51, %v1099_v49  ;;  %v530_v61 = vsel %vm230_vm1, %v519_v48, 0.0  ;;  %v741_v60 = vsub.f32 %v721_v52, %v1914_v40  ;;  %v942_v52 = vpop.f32.mrf.mxu2 }
 0x183   :  { %v531_v0 = vadd.f32 %v530_v61, %v529_v21 }
 0x184   :  { %v757_v4 = vmul.f32 %v741_v60, %v741_v60 }
 0x186   :  { %v765_v5 = vadd.f32 %v757_v4, %v749_v56  ;;  %v669_v56 = vpop.permute.xlu1 %668 }
 0x187   :  { %v376_v6 = vpop.f32.mrf.mxu0 }
 0x188   :  { %vm781_vm15 = vcmp.lt.f32.partialorder %v765_v5, %v1942_v18  ;;  %v520_v8 = vmul.f32 %v1863_v43, %v376_v6  ;;  %v1092_v5 = vmul.f32 %v1960_v27, %v942_v52  ;;  %v681_v6 = vsub.f32 %v669_v56, %v1920_v44 }
 0x189   :  { %v2006_v54 = vsel %vm781_vm15, 1.0, %v1506_v30  ;;  %v726_v62 = vpop.permute.xlu0 %725 }
 0x18a   :  { %806 = vst.msk [vmem:[#allocation5 + $0x68] sm:$0xff] %vm230_vm1, %v2006_v54  ;;  %v532_v9 = vsel %vm230_vm1, %v520_v8, 0.0  ;;  %v742_v10 = vsub.f32 %v726_v62, %v1914_v40  ;;  %v945_v58 = vpop.f32.mrf.mxu2  ;;  %v1368_v33 = vpack.i.bf16 %v2006_v54, %v1863_v43 }
 0x18b   :  { %v533_v11 = vadd.f32 %v532_v9, %v531_v0  ;;  %v1093_v9 = vmul.f32 %v1965_v28, %v945_v58 }
 0x18c   :  { %v758_v41 = vmul.f32 %v742_v10, %v742_v10 }
 0x18e   :  { %v766_v13 = vadd.f32 %v758_v41, %v750_v12  ;;  %v1069_v41 = vsel %vm230_vm1, %v1960_v27, 0.0 }
 0x18f   :  { %v379_v14 = vpop.f32.mrf.mxu0  ;;  %v1070_v44 = vadd.f32 %v1069_v41, %v1996_v1 }
 0x190   :  { %vm782_vm0 = vcmp.lt.f32.partialorder %v766_v13, %v1942_v18  ;;  %v521_v15 = vmul.f32 %v1878_v55, %v379_v14  ;;  %v1102_v13 = vsel %vm230_vm1, %v1092_v5, 0.0  ;;  %v751_v14 = vmul.f32 %v681_v6, %v681_v6 }
 0x191   :  { %v2015_v50 = vsel %vm782_vm0, 1.0, %v1506_v30 }
 0x192   :  { %807 = vst.msk [vmem:[#allocation5 + $0x70] sm:$0xff] %vm230_vm1, %v2015_v50  ;;  %v534_v16 = vsel %vm230_vm1, %v521_v15, 0.0  ;;  %v948_v60 = vpop.f32.mrf.mxu2 }
 0x193   :  { %v535_v17 = vadd.f32 %v534_v16, %v533_v11  ;;  %v1094_v15 = vmul.f32 %v2006_v54, %v948_v60 }
 0x197   :  { %v382_v19 = vpop.f32.mrf.mxu0 }
 0x198   :  { %v522_v20 = vmul.f32 %v1881_v57, %v382_v19 }
 0x19a   :  { %v536_v21 = vsel %vm230_vm1, %v522_v20, 0.0  ;;  %v951_v10 = vpop.f32.mrf.mxu2 }
 0x19b   :  { %v537_v24 = vadd.f32 %v536_v21, %v535_v17 }
 0x19d   :  { %538 = vadd.xlane.f32.xlu0 %v537_v24  ;;  %v1103_v24 = vadd.f32 %v1102_v13, %v1990_v59  ;;  %v1106_v59 = vsel %vm230_vm1, %v1094_v15, 0.0 }
 0x1a2   :  { %v954_v56 = vpop.f32.mrf.mxu2 }
 0x1a5   :  { %v1040_v29 = vpop.f32.mrf.mxu3 }
 0x1a6   :  { %v1141_v37 = vmul.f32 %v1951_v22, %v1040_v29  ;;  %v1095_v29 = vmul.f32 %v2015_v50, %v951_v10 }
 0x1a8   :  { %v1149_v45 = vsel %vm230_vm1, %v1141_v37, 0.0  ;;  %v1071_v37 = vsel %vm230_vm1, %v1965_v28, 0.0  ;;  %v1108_v60 = vsel %vm230_vm1, %v1095_v29, 0.0 }
 0x1ad   :  { %v1043_v39 = vpop.f32.mrf.mxu3 }
 0x1ae   :  { %v1142_v42 = vmul.f32 %v1954_v25, %v1043_v39  ;;  %v1073_v39 = vsel %vm230_vm1, %v2006_v54, 0.0 }
 0x1b0   :  { %v1150_v46 = vsel %vm230_vm1, %v1142_v42, 0.0 }
 0x1b1   :  { %v1151_v34 = vadd.f32 %v1150_v46, %v1149_v45 }
 0x1b5   :  { %v1046_v38 = vpop.f32.mrf.mxu3 }
 0x1b6   :  { %v1143_v47 = vmul.f32 %v1957_v26, %v1046_v38  ;;  %v1072_v38 = vadd.f32 %v1071_v37, %v1070_v44  ;;  %v1370_v26 = vpack.i.bf16 %v2015_v50, %v1878_v55 }
 0x1b8   :  { %v1152_v49 = vsel %vm230_vm1, %v1143_v47, 0.0 }
 0x1b9   :  { %v1153_v48 = vadd.f32 %v1152_v49, %v1151_v34  ;;  %v1104_v34 = vsel %vm230_vm1, %v1093_v9, 0.0 }
 0x1ba   :  { %v1105_v52 = vadd.f32 %v1104_v34, %v1103_v24 }
 0x1bd   :  { %v1049_v51 = vpop.f32.mrf.mxu3 }
 0x1be   :  { %v1144_v7 = vmul.f32 %v1960_v27, %v1049_v51  ;;  %v1075_v51 = vsel %vm230_vm1, %v2015_v50, 0.0 }
 0x1c0   :  { %v1154_v17 = vsel %vm230_vm1, %v1144_v7, 0.0 }
 0x1c5   :  { %v1052_v53 = vpop.f32.mrf.mxu3 }
 0x1c6   :  { %v1145_v11 = vmul.f32 %v1965_v28, %v1052_v53 }
 0x1c8   :  { %v1156_v42 = vsel %vm230_vm1, %v1145_v11, 0.0 }
 0x1cd   :  { %v1055_v61 = vpop.f32.mrf.mxu3 }
 0x1ce   :  { %v1146_v19 = vmul.f32 %v2006_v54, %v1055_v61  ;;  %v1074_v61 = vadd.f32 %v1073_v39, %v1072_v38  ;;  %v1364_v38 = vpack.i.bf16 %v1960_v27, %v1842_v35 }
 0x1d0   :  { %v1158_v47 = vsel %vm230_vm1, %v1146_v19, 0.0  ;;  %v1076_v5 = vadd.f32 %v1075_v51, %v1074_v61 }
 0x1d2   :  { %v506_v0 = vpop.xlane.xlu2 %505 }
 0x1d3   :  { %v507_v4 = vrot.slane %v506_v0, 4 }
 0x1d5   :  { %v508_v23 = vadd.f32 %v507_v4, %v506_v0  ;;  %v1058_v62 = vpop.f32.mrf.mxu3 }
 0x1d6   :  { %v1147_v1 = vmul.f32 %v2015_v50, %v1058_v62 }
 0x1d7   :  { %v509_v8 = vrot.slane %v508_v23, 2 }
 0x1d8   :  { %v1160_v0 = vsel %vm230_vm1, %v1147_v1, 0.0 }
 0x1d9   :  { %v510_v12 = vadd.f32 %v509_v8, %v508_v23 }
 0x1da   :  { %v731_v16 = vpop.permute.xlu2 %730 }
 0x1db   :  { %v743_v20 = vsub.f32 %v731_v16, %v1914_v40  ;;  %v511_v21 = vrot.slane %v510_v12, 1  ;;  %v1155_v40 = vadd.f32 %v1154_v17, %v1153_v48  ;;  %v1107_v48 = vadd.f32 %v1106_v59, %v1105_v52 }
 0x1dc   :  { %v591_v41 = vpop.xlane.xlu1 %590  ;;  %v1366_v59 = vpack.i.bf16 %v1965_v28, %v1845_v36 }
 0x1dd   :  { %v759_v45 = vmul.f32 %v743_v20, %v743_v20  ;;  %v512_v46 = vadd.f32 %v511_v21, %v510_v12  ;;  %v1157_v53 = vadd.f32 %v1156_v42, %v1155_v40  ;;  %v1061_v58 = vpop.f32.mrf.mxu3 }
 0x1df   :  { %v767_v49 = vadd.f32 %v759_v45, %v751_v14  ;;  %1330 = vpush %v512_v46  ;;  %v1159_v4 = vadd.f32 %v1158_v47, %v1157_v53  ;;  %v592_v14 = vrot.slane %v591_v41, 4 }
 0x1e1   :  { %vm783_vm2 = vcmp.lt.f32.partialorder %v767_v49, %v1942_v18  ;;  %v1161_v9 = vadd.f32 %v1160_v0, %v1159_v4  ;;  %v1109_v18 = vadd.f32 %v1108_v60, %v1107_v48  ;;  %v593_v19 = vadd.f32 %v592_v14, %v591_v41 }
 0x1e2   :  { %v2058_v23 = vsel %vm783_vm2, 1.0, %v1506_v30 }
 0x1e3   :  { %808 = vst.msk [vmem:[#allocation5 + $0x78] sm:$0xff] %vm230_vm1, %v2058_v23  ;;  %v1148_v6 = vmul.f32 %v2058_v23, %v1061_v58  ;;  %v1077_v7 = vsel %vm230_vm1, %v2058_v23, 0.0  ;;  %v1096_v8 = vmul.f32 %v2058_v23, %v954_v56  ;;  %v594_v24 = vrot.slane %v593_v19, 2 }
 0x1e4   :  { %v1078_v62 = vadd.f32 %v1077_v7, %v1076_v5  ;;  %1208 = dma.vmem_to_hbm [thread:$0]  %s1201_s7, 2048, %s1203_s20, [#allocation4], %s1508_s21, %s1508_s21, %s1509_s4  }
 0x1e5   :  { %v1162_v10 = vsel %vm230_vm1, %v1148_v6, 0.0  ;;  %v1110_v11 = vsel %vm230_vm1, %v1096_v8, 0.0 }
 0x1e6   :  { %1079 = vadd.xlane.f32.xlu2 %v1078_v62  ;;  %v1163_v30 = vadd.f32 %v1162_v10, %v1161_v9  ;;  %v1111_v12 = vadd.f32 %v1110_v11, %v1109_v18 }
 0x1e8   :  { %1164 = vadd.xlane.f32.xlu1 %v1163_v30  ;;  %1112 = vadd.xlane.f32.xlu0 %v1111_v12 }
 0x210   :  { %v539_v13 = vpop.xlane.xlu0 %538  ;;  %s1331_s1 = spop %1330 }
 0x211   :  { %v540_v15 = vrot.slane %v539_v13, 4  ;;  %s514_s26 = sadd.f32 1e-06, %s1331_s1  ;;  %v618_v16 = vstv %s1331_s1  ;;  %1359 = vxpose.xlu0.b32.start [1/8] (short) (narrow) %v1358_v63, 64  ;;  %v595_v63 = vadd.f32 %v594_v24, %v593_v19 }
 0x212   :  { %619 = vst.msk [vmem:[%s2152_s13] sm:$0x1] %vm565_vm3, %v618_v16 }
 0x213   :  { %v541_v44 = vadd.f32 %v540_v15, %v539_v13  ;;  %v547_v17 = vstv %s514_s26  ;;  %v596_v46 = vrot.slane %v595_v63, 1 }
 0x214   :  { %1420 = vrcp.f32 %v547_v17  ;;  %v559_v42 = vand.u32 2147483648, %v547_v17  ;;  %v557_v45 = vand.u32 2147483647, %v547_v17  ;;  %vm553_vm5 = vweird.f32 %v547_v17 }
 0x215   :  { %v542_v20 = vrot.slane %v541_v44, 2  ;;  %v597_v40 = vadd.f32 %v596_v46, %v595_v63 }
 0x216   :  { %v560_v32 = vor.u32 1.1754944e-38, %v559_v42  ;;  %vm558_vm7 = vcmp.eq.f32.partialorder %v557_v45, 8.507059e+37 }
 0x217   :  { %v543_v21 = vadd.f32 %v542_v20, %v541_v44 }
 0x219   :  { %v544_v29 = vrot.slane %v543_v21, 1  ;;  %1361 = vxpose.xlu0.b32.cont [2/8] (short) (narrow) %v1360_v2, 64 }
 0x21a   :  { %v1421_v37 = vpop.eup %1420 }
 0x21b   :  { %v545_v31 = vadd.f32 %v544_v29, %v543_v21  ;;  %v549_v22 = vmul.f32 %v1421_v37, %v547_v17  ;;  %vm554_vm4 = vweird.f32 %v1421_v37 }
 0x21c   :  { %vm555_vm6 = vmor %vm553_vm5, %vm554_vm4 }
 0x21d   :  { %1332 = vpush %v545_v31  ;;  %v550_v39 = vsub.f32 1.0, %v549_v22 }
 0x21f   :  { %v551_v1 = vmul.f32 %v1421_v37, %v550_v39 }
 0x221   :  { %1363 = vxpose.xlu0.b32.cont [3/8] (short) (narrow) %v1362_v3, 64  ;;  %v552_v34 = vadd.f32 %v1421_v37, %v551_v1  ;;  %v1372_v3 = vpack.i.bf16 %v2058_v23, %v1881_v57 }
 0x223   :  { %v556_v25 = vsel %vm555_vm6, %v1421_v37, %v552_v34 }
 0x224   :  { %v561_v2 = vsel %vm558_vm7, %v560_v32, %v556_v25 }
 0x225   :  { %1334 = vpush %v561_v2 }
 0x226   :  { %1336 = vpush %v597_v40 }
 0x229   :  { %1365 = vxpose.xlu0.b32.cont [4/8] (short) (narrow) %v1364_v38, 64 }
 0x231   :  { %1367 = vxpose.xlu0.b32.cont [5/8] (short) (narrow) %v1366_v59, 64 }
 0x239   :  { %1369 = vxpose.xlu0.b32.cont [6/8] (short) (narrow) %v1368_v33, 64 }
 0x241   :  { %1371 = vxpose.xlu0.b32.cont [7/8] (short) (narrow) %v1370_v26, 64 }
 0x249   :  { %1373 = vxpose.xlu0.b32.end [8/8] (short) (narrow) %v1372_v3, 64 }
 0x24e   :  { %s1333_s29 = spop %1332 }
 0x256   :  { %s1335_s30 = spop %1334 }
 0x257   :  { %s563_s14 = smul.f32 %s1335_s30, %s1333_s29  ;;  %s1337_s15 = spop %1336 }
 0x258   :  { %s615_s8 = smul.f32 %s1337_s15, %s1335_s30  ;;  %s1510_s30 = smov [#allocation6]  }
 0x259   :  { %v564_v35 = vstv %s563_s14  ;;  %v1080_v36 = vpop.xlane.xlu2 %1079  ;;  %s1213_s14 = sshll.u32 %s1510_s30, 4  ;;  %s1214_s14 = int_to_ptr.vmem [resolvable:$true] %s1213_s14 }
 0x25a   :  { %566 = vst.msk [vmem:[%s2150_s11] sm:$0x1] %vm565_vm3, %v564_v35  ;;  %v616_v43 = vstv %s615_s8  ;;  %v1081_v27 = vrot.slane %v1080_v36, 4 }
 0x25b   :  { %617 = vst.msk [vmem:[%s2151_s12] sm:$0x1] %vm565_vm3, %v616_v43  ;;  %v1113_v55 = vpop.xlane.xlu0 %1112  ;;  %v1165_v60 = vpop.xlane.xlu1 %1164 }
 0x25c   :  { %v1082_v57 = vadd.f32 %v1081_v27, %v1080_v36  ;;  %v1114_v28 = vrot.slane %v1113_v55, 4  ;;  %v1166_v0 = vrot.slane %v1165_v60, 4 }
 0x25e   :  { %v1083_v54 = vrot.slane %v1082_v57, 2  ;;  %v1115_v50 = vadd.f32 %v1114_v28, %v1113_v55  ;;  %v1167_v4 = vadd.f32 %v1166_v0, %v1165_v60 }
 0x260   :  { %v1084_v47 = vadd.f32 %v1083_v54, %v1082_v57  ;;  %v1116_v49 = vrot.slane %v1115_v50, 2  ;;  %v1168_v23 = vrot.slane %v1167_v4, 2 }
 0x262   :  { %v1085_v51 = vrot.slane %v1084_v47, 1  ;;  %v1117_v52 = vadd.f32 %v1116_v49, %v1115_v50  ;;  %v1169_v7 = vadd.f32 %v1168_v23, %v1167_v4 }
 0x264   :  { %v1086_v53 = vadd.f32 %v1085_v51, %v1084_v47  ;;  %v1118_v58 = vrot.slane %v1117_v52, 1  ;;  %v1170_v10 = vrot.slane %v1169_v7, 1 }
 0x266   :  { %1338 = vpush %v1086_v53  ;;  %v1119_v61 = vadd.f32 %v1118_v58, %v1117_v52  ;;  %v1171_v13 = vadd.f32 %v1170_v10, %v1169_v7 }
 0x268   :  { %1340 = vpush %v1119_v61 }
 0x297   :  { %s1339_s0 = spop %1338 }
 0x298   :  { %s1088_s22 = sadd.f32 1e-06, %s1339_s0  ;;  %v1193_v48 = vstv %s1339_s0 }
 0x299   :  { %1329 = vst.msk [vmem:[%s2152_s13 + $0x1] sm:$0x1] %vm565_vm3, %v1193_v48  ;;  %s1341_s9 = spop %1340 }
 0x29a   :  { %v1121_v56 = vstv %s1088_s22 }
 0x29b   :  { %1422 = vrcp.f32 %v1121_v56  ;;  %v1133_v62 = vand.u32 2147483648, %v1121_v56  ;;  %v1131_v18 = vand.u32 2147483647, %v1121_v56  ;;  %vm1127_vm9 = vweird.f32 %v1121_v56 }
 0x29d   :  { %v1134_v30 = vor.u32 1.1754944e-38, %v1133_v62  ;;  %vm1132_vm11 = vcmp.eq.f32.partialorder %v1131_v18, 8.507059e+37 }
 0x2a1   :  { %v1423_v5 = vpop.eup %1422 }
 0x2a2   :  { %v1123_v6 = vmul.f32 %v1423_v5, %v1121_v56  ;;  %vm1128_vm8 = vweird.f32 %v1423_v5 }
 0x2a3   :  { %vm1129_vm10 = vmor %vm1127_vm9, %vm1128_vm8 }
 0x2a4   :  { %v1124_v8 = vsub.f32 1.0, %v1123_v6 }
 0x2a6   :  { %v1125_v9 = vmul.f32 %v1423_v5, %v1124_v8 }
 0x2a8   :  { %v1126_v11 = vadd.f32 %v1423_v5, %v1125_v9 }
 0x2aa   :  { %v1130_v12 = vsel %vm1129_vm10, %v1423_v5, %v1126_v11 }
 0x2ab   :  { %v1135_v41 = vsel %vm1132_vm11, %v1134_v30, %v1130_v12 }
 0x2ac   :  { %1342 = vpush %v1135_v41 }
 0x2ad   :  { %1344 = vpush %v1171_v13 }
 0x2b5   :  { %v1374_v14 = vpop.trf.xlu0 }
 0x2b6   :  { %v1378_v15 = vunpack.i.h.bf16 %v1374_v14  ;;  %v1375_v16 = vunpack.i.l.bf16 %v1374_v14 }
 0x2b8   :  { %842 = vst.msk [vmem:[#allocation6 + $0x40] sm:$0xff] %vm230_vm1, %v1378_v15 }
 0x2b9   :  { %271 = vst.msk [vmem:[#allocation6] sm:$0xff] %vm230_vm1, %v1375_v16 }
 0x2bd   :  { %v1379_v44 = vpop.trf.xlu0 }
 0x2be   :  { %v1383_v17 = vunpack.i.h.bf16 %v1379_v44  ;;  %v1380_v19 = vunpack.i.l.bf16 %v1379_v44 }
 0x2c0   :  { %843 = vst.msk [vmem:[#allocation6 + $0x48] sm:$0xff] %vm230_vm1, %v1383_v17 }
 0x2c1   :  { %272 = vst.msk [vmem:[#allocation6 + $0x8] sm:$0xff] %vm230_vm1, %v1380_v19 }
 0x2c5   :  { %v1384_v20 = vpop.trf.xlu0 }
 0x2c6   :  { %v1388_v21 = vunpack.i.h.bf16 %v1384_v20  ;;  %v1385_v24 = vunpack.i.l.bf16 %v1384_v20 }
 0x2c8   :  { %844 = vst.msk [vmem:[#allocation6 + $0x50] sm:$0xff] %vm230_vm1, %v1388_v21 }
 0x2c9   :  { %273 = vst.msk [vmem:[#allocation6 + $0x10] sm:$0xff] %vm230_vm1, %v1385_v24 }
 0x2cd   :  { %v1389_v29 = vpop.trf.xlu0 }
 0x2ce   :  { %v1393_v37 = vunpack.i.h.bf16 %v1389_v29  ;;  %v1390_v31 = vunpack.i.l.bf16 %v1389_v29 }
 0x2d0   :  { %845 = vst.msk [vmem:[#allocation6 + $0x58] sm:$0xff] %vm230_vm1, %v1393_v37 }
 0x2d1   :  { %274 = vst.msk [vmem:[#allocation6 + $0x18] sm:$0xff] %vm230_vm1, %v1390_v31 }
 0x2d5   :  { %v1394_v22 = vpop.trf.xlu0 }
 0x2d6   :  { %v1398_v63 = vunpack.i.h.bf16 %v1394_v22  ;;  %v1395_v39 = vunpack.i.l.bf16 %v1394_v22 }
 0x2d8   :  { %846 = vst.msk [vmem:[#allocation6 + $0x60] sm:$0xff] %vm230_vm1, %v1398_v63 }
 0x2d9   :  { %275 = vst.msk [vmem:[#allocation6 + $0x20] sm:$0xff] %vm230_vm1, %v1395_v39 }
 0x2dd   :  { %s1343_s13 = spop %1342  ;;  %v1399_v42 = vpop.trf.xlu0 }
 0x2de   :  { %s1137_s2 = smul.f32 %s1343_s13, %s1341_s9  ;;  %s1345_s25 = spop %1344  ;;  %v1403_v1 = vunpack.i.h.bf16 %v1399_v42  ;;  %v1400_v45 = vunpack.i.l.bf16 %v1399_v42 }
 0x2df   :  { %s1189_s1 = smul.f32 %s1345_s25, %s1343_s13 }
 0x2e0   :  { %v1138_v46 = vstv %s1137_s2  ;;  %847 = vst.msk [vmem:[#allocation6 + $0x68] sm:$0xff] %vm230_vm1, %v1403_v1 }
 0x2e1   :  { %1327 = vst.msk [vmem:[%s2150_s11 + $0x1] sm:$0x1] %vm565_vm3, %v1138_v46  ;;  %v1190_v34 = vstv %s1189_s1  ;;  %s1215_s11 = sshll.u32 %s2149_s10, 4  ;;  %s1216_s11 = int_to_ptr.hbm [resolvable:$true] %s1215_s11 }
 0x2e2   :  { %1328 = vst.msk [vmem:[%s2151_s12 + $0x1] sm:$0x1] %vm565_vm3, %v1190_v34 }
 0x2e3   :  { %276 = vst.msk [vmem:[#allocation6 + $0x28] sm:$0xff] %vm230_vm1, %v1400_v45 }
 0x2e5   :  { %v1404_v32 = vpop.trf.xlu0 }
 0x2e6   :  { %v1408_v25 = vunpack.i.h.bf16 %v1404_v32  ;;  %v1405_v2 = vunpack.i.l.bf16 %v1404_v32 }
 0x2e8   :  { %848 = vst.msk [vmem:[#allocation6 + $0x70] sm:$0xff] %vm230_vm1, %v1408_v25 }
 0x2e9   :  { %277 = vst.msk [vmem:[#allocation6 + $0x30] sm:$0xff] %vm230_vm1, %v1405_v2 }
 0x2ed   :  { %v1409_v40 = vpop.trf.xlu0 }
 0x2ee   :  { %v1413_v38 = vunpack.i.h.bf16 %v1409_v40  ;;  %v1410_v59 = vunpack.i.l.bf16 %v1409_v40 }
 0x2f0   :  { %849 = vst.msk [vmem:[#allocation6 + $0x78] sm:$0xff] %vm230_vm1, %v1413_v38 }
 0x2f1   :  { %278 = vst.msk [vmem:[#allocation6 + $0x38] sm:$0xff] %vm230_vm1, %v1410_v59 }
 0x2f2   :  { %1221 = dma.vmem_to_hbm [thread:$0]  %s1214_s14, 2048, %s1216_s11, [#allocation7], %s1508_s21, %s1508_s21, %s1509_s4  }
 0x2f3   :  { %1498 = dma.done.wait [#allocation4], 2048  }
 0x2f4   :  { %1499 = vsyncadd [#allocation4], 4294965248 }
 0x2f5   :  { %1500 = dma.done.wait [#allocation7], 2048  }
 0x2f6   :  { %1501 = vsyncadd [#allocation7], 4294965248 }
 0x2f7   :  { %1242 = vsyncpa [#allocation3], 1 }
 0x2f8   :  { %1243 = vsyncpa [#allocation4], 1 }
 0x2f9   :  { %1244 = vsyncpa [#allocation7], 1 }

</bundles_post_ra>
